<compile_context>
chip_gen: v6e
topology: v6e:2x2x1
jax: 0.10.0
libtpu: 0.0.40
codegen_flags: <defaults>
</compile_context>

<pallas_src>
import functools
import math

import jax
import jax.numpy as jnp
from jax import lax
from jax.experimental import pallas as pl
from jax.experimental.pallas import tpu as pltpu

SR = 16000
HOP = 64
N_HARMONICS = 16
N_NOISE_BANDS = 8
HIDDEN = 128
LATENT = 16
N_OUT = 1 + N_HARMONICS + N_NOISE_BANDS   # amp | harmonic distribution | noise mags
OUT_PAD = 128                             # lane-dense padded output width
LN10 = math.log(10.0)


# ----------------------------------------------------------------------------
# Pallas kernel 1: fused VAE (encode -> latent -> decode -> exp_sigmoid)
# ----------------------------------------------------------------------------
def _ae_mlp_kernel(f0_ref, ld_ref, eps_ref,
                   ew1_ref, eb1_ref, wmulv_ref, bmulv_ref,
                   dw1z_ref, dw1x_ref, db1_ref, dw2_ref, db2_ref,
                   y_ref):
    """One block of block_m frame rows; weights stay VMEM-resident across the grid."""
    f0s = f0_ref[...]                                    # (bm, 1) scaled f0
    lds = ld_ref[...]                                    # (bm, 1) scaled loudness

    # Encoder layer 1: [f0s | lds] @ W1 + b1 (K=2 -> two rank-1 VPU updates, no MXU).
    h = f0s * ew1_ref[0:1, :] + lds * ew1_ref[1:2, :] + eb1_ref[...]
    h = jnp.maximum(h, 0.0)                              # (bm, HIDDEN) f32

    # Fused latent heads: one (HIDDEN, 2*LATENT) bf16 matmul, slice mu/logvar.
    mulv = jnp.dot(h.astype(jnp.bfloat16), wmulv_ref[...],
                   preferred_element_type=jnp.float32) + bmulv_ref[...]
    mu = mulv[:, :LATENT]
    lv = mulv[:, LATENT:]
    std = jnp.exp(0.5 * lv)
    z = mu + std * eps_ref[...]                          # (bm, LATENT)

    # Per-row KL: sum_latent(mu^2 + var - logvar - 1); folded into spare lane N_OUT.
    kl_row = jnp.sum(mu * mu + std * std - lv - 1.0, axis=-1, keepdims=True)

    # Decoder layer 1 on [z | f0s | lds]; the 2-wide skip input is again rank-1.
    hd = jnp.dot(z.astype(jnp.bfloat16), dw1z_ref[...],
                 preferred_element_type=jnp.float32)
    hd = hd + f0s * dw1x_ref[0:1, :] + lds * dw1x_ref[1:2, :] + db1_ref[...]
    hd = jnp.maximum(hd, 0.0)                            # (bm, HIDDEN)

    # Lane-dense decoder output (128 lanes; only the first N_OUT are real).
    yy = jnp.dot(hd.astype(jnp.bfloat16), dw2_ref[...],
                 preferred_element_type=jnp.float32) + db2_ref[...]
    # exp_sigmoid: 2*sigmoid(y)^ln(10) + 1e-7 == 2*exp(-ln(10)*softplus(-y)) + 1e-7
    sp = jnp.maximum(-yy, 0.0) + jnp.log(1.0 + jnp.exp(-jnp.abs(yy)))
    y = 2.0 * jnp.exp(-LN10 * sp) + 1e-7                 # (bm, OUT_PAD)

    lane = lax.broadcasted_iota(jnp.int32, y.shape, 1)
    y_ref[...] = jnp.where(lane == N_OUT, kl_row, y)     # unmasked full-lane store


def _pick_block_m(m):
    for bm in (512, 256, 128):
        if m % bm == 0:
            return bm
    return m   # tiny demo sizes: one block


def ae_forward(params, f0_scaled, ld_scaled, eps):
    """Fused autoencoder on flattened (M, .) frame-rate rows. Returns (y, z_loss)."""
    M = f0_scaled.shape[0]
    block_m = _pick_block_m(M)
    gm = M // block_m

    # Weight packing: fused mu|logvar head, split decoder skip, lane-padded output.
    wmulv = jnp.concatenate([params["enc_wmu"], params["enc_wlv"]], axis=1)
    bmulv = jnp.concatenate([params["enc_bmu"], params["enc_blv"]]).reshape(1, -1)
    dw1z = params["dec_w1"][:LATENT].astype(jnp.bfloat16)
    dw1x = params["dec_w1"][LATENT:]
    dw2p = jnp.pad(params["dec_w2"], ((0, 0), (0, OUT_PAD - N_OUT))).astype(jnp.bfloat16)
    db2p = jnp.pad(params["dec_b2"], (0, OUT_PAD - N_OUT)).reshape(1, -1)
    ew1 = params["enc_w1"]
    eb1 = params["enc_b1"].reshape(1, -1)
    db1 = params["dec_b1"].reshape(1, -1)

    def full(a):   # whole-array VMEM block, constant index -> no re-DMA across grid
        return pl.BlockSpec(a.shape, lambda i: (0,) * a.ndim)

    row1 = pl.BlockSpec((block_m, 1), lambda i: (i, 0))
    rowz = pl.BlockSpec((block_m, LATENT), lambda i: (i, 0))

    y_full = pl.pallas_call(
        _ae_mlp_kernel,
        out_shape=jax.ShapeDtypeStruct((M, OUT_PAD), jnp.float32),
        grid=(gm,),
        in_specs=[row1, row1, rowz,
                  full(ew1), full(eb1),
                  full(wmulv), full(bmulv),
                  full(dw1z), full(dw1x), full(db1),
                  full(dw2p), full(db2p)],
        out_specs=pl.BlockSpec((block_m, OUT_PAD), lambda i: (i, 0)),
        compiler_params=pltpu.CompilerParams(dimension_semantics=("parallel",)),
    )(f0_scaled, ld_scaled, eps,
      ew1, eb1, wmulv.astype(jnp.bfloat16), bmulv, dw1z, dw1x, db1, dw2p, db2p)

    z_loss = 0.5 * jnp.mean(y_full[:, N_OUT])   # KL folded into spare lane N_OUT
    return y_full[:, :N_OUT], z_loss


# ----------------------------------------------------------------------------
# Pallas kernel 2: fused upsample + harmonic oscillator bank + noise
# ----------------------------------------------------------------------------
def _synth_kernel(phase_ref, amps_ref, noise_ref, w_ref, o_ref):
    """One (sample-block, batch) tile. Samples on lanes; noise gain is row H of amps."""
    w = w_ref[...].astype(jnp.bfloat16)                                 # (T, bs)
    # Frame->sample linear interpolation for ALL controls as one bf16 MXU matmul:
    # rows 0..H-1 = harmonic amplitudes, row H = broadband noise gain.
    amps_up = jnp.dot(amps_ref[...].astype(jnp.bfloat16), w,
                      preferred_element_type=jnp.float32)               # (H+1, bs)

    theta = phase_ref[...]                                              # (1, bs)
    s1 = jnp.sin(theta)                                                 # EUP x1
    two_c = 2.0 * jnp.cos(theta)                                        # EUP x1

    # Chebyshev recurrence: sin(h*t) = 2*cos(t)*sin((h-1)*t) - sin((h-2)*t).
    acc = amps_up[0:1, :] * s1 + amps_up[N_HARMONICS:N_HARMONICS + 1, :] * noise_ref[...]
    s_prev2 = s1
    s_prev1 = two_c * s1                                                # sin(2t)
    acc = acc + amps_up[1:2, :] * s_prev1
    for h in range(2, N_HARMONICS):                                     # VPU FMAs only
        s_next = two_c * s_prev1 - s_prev2
        acc = acc + amps_up[h:h + 1, :] * s_next
        s_prev2, s_prev1 = s_prev1, s_next
    o_ref[...] = acc                                                    # (1, bs)


def harmonic_plus_noise(phase, amps_ng, noise, w_up, block_s=None):
    """phase/noise: (B, S); amps_ng: (B, H+1, T) (row H = noise gain); w_up: (T, S)."""
    B, S = phase.shape
    Hn, T = amps_ng.shape[1], amps_ng.shape[2]
    if block_s is None:
        block_s = S      # S=512 working set is tiny -> single block per batch row.
    assert S % block_s == 0 and (block_s % 128 == 0 or block_s == S)
    # Batch innermost: the (T, block_s) interpolation block index repeats across
    # consecutive steps, so Pallas skips its re-DMA for every batch row.
    grid = (S // block_s, B)
    # TODO(synk): for minutes-long audio, window the frame axis per sample block
    # (feed only ~block_s/HOP + 1 frames via a block-local interp matrix), pick
    # block_s from a per-generation VMEM table (<=8-16 MiB per tile on v7x), and
    # carry phase across sample blocks in SMEM with that axis marked "arbitrary".
    out = pl.pallas_call(
        _synth_kernel,
        out_shape=jax.ShapeDtypeStruct((B, 1, S), jnp.float32),
        grid=grid,
        in_specs=[
            pl.BlockSpec((None, 1, block_s), lambda i, b: (b, 0, i)),   # phase
            pl.BlockSpec((None, Hn, T), lambda i, b: (b, 0, 0)),        # frame ctrl
            pl.BlockSpec((None, 1, block_s), lambda i, b: (b, 0, i)),   # noise
            pl.BlockSpec((T, block_s), lambda i, b: (0, i)),            # interp matrix
        ],
        out_specs=pl.BlockSpec((None, 1, block_s), lambda i, b: (b, 0, i)),
        compiler_params=pltpu.CompilerParams(
            dimension_semantics=("parallel", "parallel")),
    )(phase.reshape(B, 1, S), amps_ng, noise.reshape(B, 1, S), w_up)
    return out.reshape(B, S)


# ----------------------------------------------------------------------------
# Glue (parameter init, feature scaling, interpolation matrix, phase)
# ----------------------------------------------------------------------------
def init_params(key):
    ks = jax.random.split(key, 5)

    def w(k, shape):
        return 0.1 * jax.random.normal(k, shape, jnp.float32)

    return {
        "enc_w1": w(ks[0], (2, HIDDEN)), "enc_b1": jnp.zeros((HIDDEN,), jnp.float32),
        "enc_wmu": w(ks[1], (HIDDEN, LATENT)), "enc_bmu": jnp.zeros((LATENT,), jnp.float32),
        "enc_wlv": w(ks[2], (HIDDEN, LATENT)), "enc_blv": jnp.zeros((LATENT,), jnp.float32),
        "dec_w1": w(ks[3], (LATENT + 2, HIDDEN)), "dec_b1": jnp.zeros((HIDDEN,), jnp.float32),
        "dec_w2": w(ks[4], (HIDDEN, N_OUT)), "dec_b2": jnp.zeros((N_OUT,), jnp.float32),
    }


def hz_to_midi(f):
    return 12.0 * jnp.log2(jnp.maximum(f, 1e-5) / 440.0) + 69.0


def make_upsample_matrix(n_frames, n_samples):
    """(T, S) linear-interpolation matrix so that x_up = x_frames @ W."""
    pos = jnp.linspace(0.0, n_frames - 1.0, n_samples)
    i0 = jnp.floor(pos).astype(jnp.int32)
    i1 = jnp.minimum(i0 + 1, n_frames - 1)
    frac = pos - i0.astype(jnp.float32)
    t_idx = jnp.arange(n_frames)[:, None]
    return ((t_idx == i0[None, :]).astype(jnp.float32) * (1.0 - frac)[None, :]
            + (t_idx == i1[None, :]).astype(jnp.float32) * frac[None, :])


def ddsp_forward(params, conditioning, eps, noise, n_samples):
    """Mirrors DDSPSynth.forward: ae_model(conditioning) -> fill_params -> synth."""
    f0 = conditioning["f0_hz"]          # (B, T, 1)
    ld = conditioning["loudness_db"]    # (B, T, 1)
    B, T, _ = f0.shape

    # --- ae_model (encode -> latent -> decode): one fused Pallas kernel ---
    f0_scaled = (hz_to_midi(f0) / 127.0).reshape(B * T, 1)
    ld_scaled = (ld / 120.0 + 1.0).reshape(B * T, 1)
    y, z_loss = ae_forward(params, f0_scaled, ld_scaled, eps.reshape(B * T, LATENT))

    # --- synth.fill_params (frame rate, tiny -> plain JAX) ---
    amp = y[:, :1].reshape(B, T, 1)
    harm_distr = y[:, 1:1 + N_HARMONICS].reshape(B, T, N_HARMONICS)
    noise_mags = y[:, 1 + N_HARMONICS:].reshape(B, T, N_NOISE_BANDS)
    # remove_above_nyquist: zero harmonics with h*f0 > SR/2, then renormalize.
    harm_idx = jnp.arange(1, N_HARMONICS + 1, dtype=jnp.float32)
    nyq_mask = (harm_idx[None, None, :] * f0 < 0.5 * SR).astype(jnp.float32)
    harm_distr = harm_distr * nyq_mask
    harm_distr = harm_distr / (jnp.sum(harm_distr, axis=-1, keepdims=True) + 1e-7)
    harm_amps_t = jnp.transpose(amp * harm_distr, (0, 2, 1))         # (B, H, T)
    noise_gain = jnp.mean(noise_mags, axis=-1)                       # (B, T)
    # Pack noise gain as the extra frame-control row so its upsample rides the MXU.
    amps_ng = jnp.concatenate([harm_amps_t, noise_gain[:, None, :]], axis=1)
    # TODO(synk): per-band FIR-filtered noise (FFT convolution) has no clean Pallas
    # equivalent; broadband gain-modulated noise is used instead.

    # --- phase integration: fractional-cycle cumsum, wrapped before sin ---
    w_up = make_upsample_matrix(T, n_samples)                        # (T, S)
    f0_up = jnp.einsum("bt,ts->bs", f0[..., 0], w_up)
    cycles = jnp.cumsum(f0_up / SR, axis=1)
    phase = 2.0 * jnp.pi * (cycles - jnp.floor(cycles))              # bounded [0, 2pi)
    # TODO(synk): for very long audio, carry the phase across sample blocks inside
    # the synth kernel (sequential grid axis + SMEM carry) instead of this global
    # f32 XLA cumsum, which loses fractional precision past ~1e4 cumulative cycles.

    # --- synth: fused upsample + harmonic bank + noise (Pallas) ---
    resyn_audio = harmonic_plus_noise(phase, amps_ng, noise, w_up)
    return resyn_audio, z_loss


# ----------------------------------------------------------------------------
# Main
# ----------------------------------------------------------------------------
if __name__ == "__main__":
    key = jax.random.PRNGKey(0)
    kp, kf, kld, ke, kn = jax.random.split(key, 5)

    B, T = 2, 8
    n_samples = T * HOP  # 512

    params = init_params(kp)
    f0_hz = 220.0 + 220.0 * jax.random.uniform(kf, (B, T, 1), jnp.float32)
    loudness_db = -60.0 * jax.random.uniform(kld, (B, T, 1), jnp.float32)
    conditioning = {"f0_hz": f0_hz, "loudness_db": loudness_db}

    eps = jax.random.normal(ke, (B, T, LATENT), jnp.float32)
    noise = jax.random.uniform(kn, (B, n_samples), jnp.float32, minval=-1.0, maxval=1.0)

    fwd = jax.jit(functools.partial(ddsp_forward, n_samples=n_samples))
    resyn_audio, z_loss = fwd(params, conditioning, eps, noise)
    jax.block_until_ready(resyn_audio)
    assert resyn_audio.shape == (B, n_samples)
    assert bool(jnp.all(jnp.isfinite(resyn_audio)))
    assert bool(jnp.isfinite(z_loss))
    print("KERNEL_OK")
</pallas_src>

<mosaic_0001>
module attributes {stable_mosaic.version = 11 : i64} {
  func.func @_ae_mlp_kernel(%arg0: i32, %arg1: memref<16x1xf32, #tpu.memory_space<vmem>>, %arg2: memref<16x1xf32, #tpu.memory_space<vmem>>, %arg3: memref<16x16xf32, #tpu.memory_space<vmem>>, %arg4: memref<2x128xf32, #tpu.memory_space<vmem>>, %arg5: memref<1x128xf32, #tpu.memory_space<vmem>>, %arg6: memref<128x32xbf16, #tpu.memory_space<vmem>>, %arg7: memref<1x32xf32, #tpu.memory_space<vmem>>, %arg8: memref<16x128xbf16, #tpu.memory_space<vmem>>, %arg9: memref<2x128xf32, #tpu.memory_space<vmem>>, %arg10: memref<1x128xf32, #tpu.memory_space<vmem>>, %arg11: memref<128x128xbf16, #tpu.memory_space<vmem>>, %arg12: memref<1x128xf32, #tpu.memory_space<vmem>>, %arg13: memref<16x128xf32, #tpu.memory_space<vmem>>) attributes {dimension_semantics = [#tpu.dimension_semantics<parallel>], iteration_bounds = array<i64: 1>, scalar_prefetch = 0 : i64, scratch_operands = 0 : i64, tpu.core_type = #tpu.core_type<tc>, window_params = [{transform_indices = @transform_0, window_bounds = array<i64: 16, 1>}, {transform_indices = @transform_1, window_bounds = array<i64: 16, 1>}, {transform_indices = @transform_2, window_bounds = array<i64: 16, 16>}, {pipeline_mode = #tpu.pipeline_mode<synchronous>, transform_indices = @transform_3, window_bounds = array<i64: 2, 128>}, {pipeline_mode = #tpu.pipeline_mode<synchronous>, transform_indices = @transform_4, window_bounds = array<i64: 1, 128>}, {pipeline_mode = #tpu.pipeline_mode<synchronous>, transform_indices = @transform_5, window_bounds = array<i64: 128, 32>}, {pipeline_mode = #tpu.pipeline_mode<synchronous>, transform_indices = @transform_6, window_bounds = array<i64: 1, 32>}, {pipeline_mode = #tpu.pipeline_mode<synchronous>, transform_indices = @transform_7, window_bounds = array<i64: 16, 128>}, {pipeline_mode = #tpu.pipeline_mode<synchronous>, transform_indices = @transform_8, window_bounds = array<i64: 2, 128>}, {pipeline_mode = #tpu.pipeline_mode<synchronous>, transform_indices = @transform_9, window_bounds = array<i64: 1, 128>}, {pipeline_mode = #tpu.pipeline_mode<synchronous>, transform_indices = @transform_10, window_bounds = array<i64: 128, 128>}, {pipeline_mode = #tpu.pipeline_mode<synchronous>, transform_indices = @transform_11, window_bounds = array<i64: 1, 128>}, {transform_indices = @transform_12, window_bounds = array<i64: 16, 128>}]} {
    %c0 = arith.constant 0 : index
    %c0_0 = arith.constant 0 : index
    %0 = vector.load %arg1[%c0, %c0_0] : memref<16x1xf32, #tpu.memory_space<vmem>>, vector<16x1xf32>
    %c0_1 = arith.constant 0 : index
    %c0_2 = arith.constant 0 : index
    %1 = vector.load %arg2[%c0_1, %c0_2] : memref<16x1xf32, #tpu.memory_space<vmem>>, vector<16x1xf32>
    %c0_3 = arith.constant 0 : index
    %c0_4 = arith.constant 0 : index
    %2 = vector.load %arg4[%c0_3, %c0_4] : memref<2x128xf32, #tpu.memory_space<vmem>>, vector<1x128xf32>
    %3 = vector.broadcast %0 : vector<16x1xf32> to vector<16x128xf32>
    %4 = vector.broadcast %2 : vector<1x128xf32> to vector<16x128xf32>
    %5 = arith.mulf %3, %4 : vector<16x128xf32>
    %c1 = arith.constant 1 : index
    %c0_5 = arith.constant 0 : index
    %6 = vector.load %arg4[%c1, %c0_5] : memref<2x128xf32, #tpu.memory_space<vmem>>, vector<1x128xf32>
    %7 = vector.broadcast %1 : vector<16x1xf32> to vector<16x128xf32>
    %8 = vector.broadcast %6 : vector<1x128xf32> to vector<16x128xf32>
    %9 = arith.mulf %7, %8 : vector<16x128xf32>
    %10 = arith.addf %5, %9 : vector<16x128xf32>
    %c0_6 = arith.constant 0 : index
    %c0_7 = arith.constant 0 : index
    %11 = vector.load %arg5[%c0_6, %c0_7] : memref<1x128xf32, #tpu.memory_space<vmem>>, vector<1x128xf32>
    %12 = vector.broadcast %11 : vector<1x128xf32> to vector<16x128xf32>
    %13 = arith.addf %10, %12 : vector<16x128xf32>
    %cst = arith.constant 0.000000e+00 : f32
    %14 = vector.broadcast %cst : f32 to vector<16x128xf32>
    %15 = arith.maximumf %13, %14 : vector<16x128xf32>
    %16 = arith.truncf %15 : vector<16x128xf32> to vector<16x128xbf16>
    %c0_8 = arith.constant 0 : index
    %c0_9 = arith.constant 0 : index
    %17 = vector.load %arg6[%c0_8, %c0_9] : memref<128x32xbf16, #tpu.memory_space<vmem>>, vector<128x32xbf16>
    %cst_10 = arith.constant dense<0.000000e+00> : vector<16x32xf32>
    %18 = tpu.matmul %16, %17, %cst_10 {dimension_numbers = #tpu.dot_dimension_numbers<[1], [0], [0], [1], [0, 0, 1, 1], [], []>} : vector<16x128xbf16>, vector<128x32xbf16>, vector<16x32xf32> -> vector<16x32xf32>
    %c0_11 = arith.constant 0 : index
    %c0_12 = arith.constant 0 : index
    %19 = vector.load %arg7[%c0_11, %c0_12] : memref<1x32xf32, #tpu.memory_space<vmem>>, vector<1x32xf32>
    %20 = vector.broadcast %19 : vector<1x32xf32> to vector<16x32xf32>
    %21 = arith.addf %18, %20 : vector<16x32xf32>
    %22 = vector.extract_strided_slice %21 {offsets = [0, 0], sizes = [16, 16], strides = [1, 1]} : vector<16x32xf32> to vector<16x16xf32>
    %23 = vector.extract_strided_slice %21 {offsets = [0, 16], sizes = [16, 16], strides = [1, 1]} : vector<16x32xf32> to vector<16x16xf32>
    %cst_13 = arith.constant 5.000000e-01 : f32
    %24 = vector.broadcast %cst_13 : f32 to vector<16x16xf32>
    %25 = arith.mulf %24, %23 : vector<16x16xf32>
    %26 = math.exp %25 : vector<16x16xf32>
    %c0_14 = arith.constant 0 : index
    %c0_15 = arith.constant 0 : index
    %27 = vector.load %arg3[%c0_14, %c0_15] : memref<16x16xf32, #tpu.memory_space<vmem>>, vector<16x16xf32>
    %28 = arith.mulf %26, %27 : vector<16x16xf32>
    %29 = arith.addf %22, %28 : vector<16x16xf32>
    %30 = arith.mulf %22, %22 : vector<16x16xf32>
    %31 = arith.mulf %26, %26 : vector<16x16xf32>
    %32 = arith.addf %30, %31 : vector<16x16xf32>
    %33 = arith.subf %32, %23 : vector<16x16xf32>
    %cst_16 = arith.constant 1.000000e+00 : f32
    %34 = vector.broadcast %cst_16 : f32 to vector<16x16xf32>
    %35 = arith.subf %33, %34 : vector<16x16xf32>
    %cst_17 = arith.constant dense<0.000000e+00> : vector<16xf32>
    %36 = vector.multi_reduction <add>, %35, %cst_17 [1] : vector<16x16xf32> to vector<16xf32>
    %37 = vector.shape_cast %36 : vector<16xf32> to vector<16x1xf32>
    %38 = arith.truncf %29 : vector<16x16xf32> to vector<16x16xbf16>
    %c0_18 = arith.constant 0 : index
    %c0_19 = arith.constant 0 : index
    %39 = vector.load %arg8[%c0_18, %c0_19] : memref<16x128xbf16, #tpu.memory_space<vmem>>, vector<16x128xbf16>
    %cst_20 = arith.constant dense<0.000000e+00> : vector<16x128xf32>
    %40 = tpu.matmul %38, %39, %cst_20 {dimension_numbers = #tpu.dot_dimension_numbers<[1], [0], [0], [1], [0, 0, 1, 1], [], []>} : vector<16x16xbf16>, vector<16x128xbf16>, vector<16x128xf32> -> vector<16x128xf32>
    %c0_21 = arith.constant 0 : index
    %c0_22 = arith.constant 0 : index
    %41 = vector.load %arg9[%c0_21, %c0_22] : memref<2x128xf32, #tpu.memory_space<vmem>>, vector<1x128xf32>
    %42 = vector.broadcast %0 : vector<16x1xf32> to vector<16x128xf32>
    %43 = vector.broadcast %41 : vector<1x128xf32> to vector<16x128xf32>
    %44 = arith.mulf %42, %43 : vector<16x128xf32>
    %45 = arith.addf %40, %44 : vector<16x128xf32>
    %c1_23 = arith.constant 1 : index
    %c0_24 = arith.constant 0 : index
    %46 = vector.load %arg9[%c1_23, %c0_24] : memref<2x128xf32, #tpu.memory_space<vmem>>, vector<1x128xf32>
    %47 = vector.broadcast %1 : vector<16x1xf32> to vector<16x128xf32>
    %48 = vector.broadcast %46 : vector<1x128xf32> to vector<16x128xf32>
    %49 = arith.mulf %47, %48 : vector<16x128xf32>
    %50 = arith.addf %45, %49 : vector<16x128xf32>
    %c0_25 = arith.constant 0 : index
    %c0_26 = arith.constant 0 : index
    %51 = vector.load %arg10[%c0_25, %c0_26] : memref<1x128xf32, #tpu.memory_space<vmem>>, vector<1x128xf32>
    %52 = vector.broadcast %51 : vector<1x128xf32> to vector<16x128xf32>
    %53 = arith.addf %50, %52 : vector<16x128xf32>
    %cst_27 = arith.constant 0.000000e+00 : f32
    %54 = vector.broadcast %cst_27 : f32 to vector<16x128xf32>
    %55 = arith.maximumf %53, %54 : vector<16x128xf32>
    %56 = arith.truncf %55 : vector<16x128xf32> to vector<16x128xbf16>
    %c0_28 = arith.constant 0 : index
    %c0_29 = arith.constant 0 : index
    %57 = vector.load %arg11[%c0_28, %c0_29] : memref<128x128xbf16, #tpu.memory_space<vmem>>, vector<128x128xbf16>
    %cst_30 = arith.constant dense<0.000000e+00> : vector<16x128xf32>
    %58 = tpu.matmul %56, %57, %cst_30 {dimension_numbers = #tpu.dot_dimension_numbers<[1], [0], [0], [1], [0, 0, 1, 1], [], []>} : vector<16x128xbf16>, vector<128x128xbf16>, vector<16x128xf32> -> vector<16x128xf32>
    %c0_31 = arith.constant 0 : index
    %c0_32 = arith.constant 0 : index
    %59 = vector.load %arg12[%c0_31, %c0_32] : memref<1x128xf32, #tpu.memory_space<vmem>>, vector<1x128xf32>
    %60 = vector.broadcast %59 : vector<1x128xf32> to vector<16x128xf32>
    %61 = arith.addf %58, %60 : vector<16x128xf32>
    %cst_33 = arith.constant 0.000000e+00 : f32
    %62 = vector.broadcast %cst_33 : f32 to vector<16x128xf32>
    %63 = arith.subf %62, %61 : vector<16x128xf32>
    %cst_34 = arith.constant 0.000000e+00 : f32
    %64 = vector.broadcast %cst_34 : f32 to vector<16x128xf32>
    %65 = arith.maximumf %63, %64 : vector<16x128xf32>
    %66 = math.absf %61 : vector<16x128xf32>
    %cst_35 = arith.constant 0.000000e+00 : f32
    %67 = vector.broadcast %cst_35 : f32 to vector<16x128xf32>
    %68 = arith.subf %67, %66 : vector<16x128xf32>
    %69 = math.exp %68 : vector<16x128xf32>
    %cst_36 = arith.constant 1.000000e+00 : f32
    %70 = vector.broadcast %cst_36 : f32 to vector<16x128xf32>
    %71 = arith.addf %70, %69 : vector<16x128xf32>
    %72 = math.log %71 : vector<16x128xf32>
    %73 = arith.addf %65, %72 : vector<16x128xf32>
    %cst_37 = arith.constant -2.30258512 : f32
    %74 = vector.broadcast %cst_37 : f32 to vector<16x128xf32>
    %75 = arith.mulf %74, %73 : vector<16x128xf32>
    %76 = math.exp %75 : vector<16x128xf32>
    %cst_38 = arith.constant 2.000000e+00 : f32
    %77 = vector.broadcast %cst_38 : f32 to vector<16x128xf32>
    %78 = arith.mulf %77, %76 : vector<16x128xf32>
    %cst_39 = arith.constant 1.000000e-07 : f32
    %79 = vector.broadcast %cst_39 : f32 to vector<16x128xf32>
    %80 = arith.addf %78, %79 : vector<16x128xf32>
    %81 = tpu.iota {dimensions = array<i32: 1>} : vector<16x128xi32>
    %c25_i32 = arith.constant 25 : i32
    %82 = vector.broadcast %c25_i32 : i32 to vector<16x128xi32>
    %83 = arith.cmpi eq, %81, %82 : vector<16x128xi32>
    %84 = vector.shape_cast %37 : vector<16x1xf32> to vector<16x1xf32>
    %85 = vector.broadcast %84 : vector<16x1xf32> to vector<16x128xf32>
    %86 = arith.select %83, %85, %80 : vector<16x128xi1>, vector<16x128xf32>
    %c0_40 = arith.constant 0 : index
    %c0_41 = arith.constant 0 : index
    %87 = vector.load %arg13[%c0_40, %c0_41] : memref<16x128xf32, #tpu.memory_space<vmem>>, vector<16x128xf32>
    tpu.vector_store %arg13[%c0_40, %c0_41], %86 {strides = array<i32>} : memref<16x128xf32, #tpu.memory_space<vmem>>, vector<16x128xf32>,
    return
  }
  func.func @transform_0(%arg0: i32) -> (i32, i32) {
    %c0_i32 = arith.constant 0 : i32
    %c0_i32_0 = arith.constant 0 : i32
    return %arg0, %c0_i32 : i32, i32
  }
  func.func @transform_1(%arg0: i32) -> (i32, i32) {
    %c0_i32 = arith.constant 0 : i32
    %c0_i32_0 = arith.constant 0 : i32
    return %arg0, %c0_i32 : i32, i32
  }
  func.func @transform_2(%arg0: i32) -> (i32, i32) {
    %c0_i32 = arith.constant 0 : i32
    %c0_i32_0 = arith.constant 0 : i32
    return %arg0, %c0_i32 : i32, i32
  }
  func.func @transform_3(%arg0: i32) -> (i32, i32) {
    %c0_i32 = arith.constant 0 : i32
    %c0_i32_0 = arith.constant 0 : i32
    %c0_i32_1 = arith.constant 0 : i32
    return %c0_i32, %c0_i32_0 : i32, i32
  }
  func.func @transform_4(%arg0: i32) -> (i32, i32) {
    %c0_i32 = arith.constant 0 : i32
    %c0_i32_0 = arith.constant 0 : i32
    %c0_i32_1 = arith.constant 0 : i32
    return %c0_i32, %c0_i32_0 : i32, i32
  }
  func.func @transform_5(%arg0: i32) -> (i32, i32) {
    %c0_i32 = arith.constant 0 : i32
    %c0_i32_0 = arith.constant 0 : i32
    %c0_i32_1 = arith.constant 0 : i32
    return %c0_i32, %c0_i32_0 : i32, i32
  }
  func.func @transform_6(%arg0: i32) -> (i32, i32) {
    %c0_i32 = arith.constant 0 : i32
    %c0_i32_0 = arith.constant 0 : i32
    %c0_i32_1 = arith.constant 0 : i32
    return %c0_i32, %c0_i32_0 : i32, i32
  }
  func.func @transform_7(%arg0: i32) -> (i32, i32) {
    %c0_i32 = arith.constant 0 : i32
    %c0_i32_0 = arith.constant 0 : i32
    %c0_i32_1 = arith.constant 0 : i32
    return %c0_i32, %c0_i32_0 : i32, i32
  }
  func.func @transform_8(%arg0: i32) -> (i32, i32) {
    %c0_i32 = arith.constant 0 : i32
    %c0_i32_0 = arith.constant 0 : i32
    %c0_i32_1 = arith.constant 0 : i32
    return %c0_i32, %c0_i32_0 : i32, i32
  }
  func.func @transform_9(%arg0: i32) -> (i32, i32) {
    %c0_i32 = arith.constant 0 : i32
    %c0_i32_0 = arith.constant 0 : i32
    %c0_i32_1 = arith.constant 0 : i32
    return %c0_i32, %c0_i32_0 : i32, i32
  }
  func.func @transform_10(%arg0: i32) -> (i32, i32) {
    %c0_i32 = arith.constant 0 : i32
    %c0_i32_0 = arith.constant 0 : i32
    %c0_i32_1 = arith.constant 0 : i32
    return %c0_i32, %c0_i32_0 : i32, i32
  }
  func.func @transform_11(%arg0: i32) -> (i32, i32) {
    %c0_i32 = arith.constant 0 : i32
    %c0_i32_0 = arith.constant 0 : i32
    %c0_i32_1 = arith.constant 0 : i32
    return %c0_i32, %c0_i32_0 : i32, i32
  }
  func.func @transform_12(%arg0: i32) -> (i32, i32) {
    %c0_i32 = arith.constant 0 : i32
    %c0_i32_0 = arith.constant 0 : i32
    return %arg0, %c0_i32 : i32, i32
  }
}

module attributes {stable_mosaic.version = 11 : i64} {
  func.func @_synth_kernel(%arg0: i32, %arg1: i32, %arg2: memref<1x1x512xf32, #tpu.memory_space<vmem>>, %arg3: memref<1x17x8xf32, #tpu.memory_space<vmem>>, %arg4: memref<1x1x512xf32, #tpu.memory_space<vmem>>, %arg5: memref<8x512xf32, #tpu.memory_space<vmem>>, %arg6: memref<1x1x512xf32, #tpu.memory_space<vmem>>) attributes {dimension_semantics = [#tpu.dimension_semantics<parallel>, #tpu.dimension_semantics<parallel>], iteration_bounds = array<i64: 1, 2>, scalar_prefetch = 0 : i64, scratch_operands = 0 : i64, tpu.core_type = #tpu.core_type<tc>, window_params = [{transform_indices = @transform_0, window_bounds = array<i64: 1, 1, 512>}, {transform_indices = @transform_1, window_bounds = array<i64: 1, 17, 8>}, {transform_indices = @transform_2, window_bounds = array<i64: 1, 1, 512>}, {transform_indices = @transform_3, window_bounds = array<i64: 8, 512>}, {transform_indices = @transform_4, window_bounds = array<i64: 1, 1, 512>}]} {
    %c0 = arith.constant 0 : index
    %c0_0 = arith.constant 0 : index
    %0 = vector.load %arg5[%c0, %c0_0] : memref<8x512xf32, #tpu.memory_space<vmem>>, vector<8x512xf32>
    %1 = arith.truncf %0 : vector<8x512xf32> to vector<8x512xbf16>
    %c0_1 = arith.constant 0 : index
    %c0_2 = arith.constant 0 : index
    %c0_3 = arith.constant 0 : index
    %2 = vector.load %arg3[%c0_1, %c0_2, %c0_3] : memref<1x17x8xf32, #tpu.memory_space<vmem>>, vector<1x17x8xf32>
    %3 = vector.shape_cast %2 : vector<1x17x8xf32> to vector<17x8xf32>
    %4 = arith.truncf %3 : vector<17x8xf32> to vector<17x8xbf16>
    %cst = arith.constant dense<0.000000e+00> : vector<17x512xf32>
    %5 = tpu.matmul %4, %1, %cst {dimension_numbers = #tpu.dot_dimension_numbers<[1], [0], [0], [1], [0, 0, 1, 1], [], []>} : vector<17x8xbf16>, vector<8x512xbf16>, vector<17x512xf32> -> vector<17x512xf32>
    %c0_4 = arith.constant 0 : index
    %c0_5 = arith.constant 0 : index
    %c0_6 = arith.constant 0 : index
    %6 = vector.load %arg2[%c0_4, %c0_5, %c0_6] : memref<1x1x512xf32, #tpu.memory_space<vmem>>, vector<1x1x512xf32>
    %7 = vector.shape_cast %6 : vector<1x1x512xf32> to vector<1x512xf32>
    %8 = math.sin %7 : vector<1x512xf32>
    %9 = math.cos %7 : vector<1x512xf32>
    %cst_7 = arith.constant 2.000000e+00 : f32
    %10 = vector.broadcast %cst_7 : f32 to vector<1x512xf32>
    %11 = arith.mulf %10, %9 : vector<1x512xf32>
    %12 = vector.extract_strided_slice %5 {offsets = [0, 0], sizes = [1, 512], strides = [1, 1]} : vector<17x512xf32> to vector<1x512xf32>
    %13 = arith.mulf %12, %8 : vector<1x512xf32>
    %14 = vector.extract_strided_slice %5 {offsets = [16, 0], sizes = [1, 512], strides = [1, 1]} : vector<17x512xf32> to vector<1x512xf32>
    %c0_8 = arith.constant 0 : index
    %c0_9 = arith.constant 0 : index
    %c0_10 = arith.constant 0 : index
    %15 = vector.load %arg4[%c0_8, %c0_9, %c0_10] : memref<1x1x512xf32, #tpu.memory_space<vmem>>, vector<1x1x512xf32>
    %16 = vector.shape_cast %15 : vector<1x1x512xf32> to vector<1x512xf32>
    %17 = arith.mulf %14, %16 : vector<1x512xf32>
    %18 = arith.addf %13, %17 : vector<1x512xf32>
    %19 = arith.mulf %11, %8 : vector<1x512xf32>
    %20 = vector.extract_strided_slice %5 {offsets = [1, 0], sizes = [1, 512], strides = [1, 1]} : vector<17x512xf32> to vector<1x512xf32>
    %21 = arith.mulf %20, %19 : vector<1x512xf32>
    %22 = arith.addf %18, %21 : vector<1x512xf32>
    %23 = arith.mulf %11, %19 : vector<1x512xf32>
    %24 = arith.subf %23, %8 : vector<1x512xf32>
    %25 = vector.extract_strided_slice %5 {offsets = [2, 0], sizes = [1, 512], strides = [1, 1]} : vector<17x512xf32> to vector<1x512xf32>
    %26 = arith.mulf %25, %24 : vector<1x512xf32>
    %27 = arith.addf %22, %26 : vector<1x512xf32>
    %28 = arith.mulf %11, %24 : vector<1x512xf32>
    %29 = arith.subf %28, %19 : vector<1x512xf32>
    %30 = vector.extract_strided_slice %5 {offsets = [3, 0], sizes = [1, 512], strides = [1, 1]} : vector<17x512xf32> to vector<1x512xf32>
    %31 = arith.mulf %30, %29 : vector<1x512xf32>
    %32 = arith.addf %27, %31 : vector<1x512xf32>
    %33 = arith.mulf %11, %29 : vector<1x512xf32>
    %34 = arith.subf %33, %24 : vector<1x512xf32>
    %35 = vector.extract_strided_slice %5 {offsets = [4, 0], sizes = [1, 512], strides = [1, 1]} : vector<17x512xf32> to vector<1x512xf32>
    %36 = arith.mulf %35, %34 : vector<1x512xf32>
    %37 = arith.addf %32, %36 : vector<1x512xf32>
    %38 = arith.mulf %11, %34 : vector<1x512xf32>
    %39 = arith.subf %38, %29 : vector<1x512xf32>
    %40 = vector.extract_strided_slice %5 {offsets = [5, 0], sizes = [1, 512], strides = [1, 1]} : vector<17x512xf32> to vector<1x512xf32>
    %41 = arith.mulf %40, %39 : vector<1x512xf32>
    %42 = arith.addf %37, %41 : vector<1x512xf32>
    %43 = arith.mulf %11, %39 : vector<1x512xf32>
    %44 = arith.subf %43, %34 : vector<1x512xf32>
    %45 = vector.extract_strided_slice %5 {offsets = [6, 0], sizes = [1, 512], strides = [1, 1]} : vector<17x512xf32> to vector<1x512xf32>
    %46 = arith.mulf %45, %44 : vector<1x512xf32>
    %47 = arith.addf %42, %46 : vector<1x512xf32>
    %48 = arith.mulf %11, %44 : vector<1x512xf32>
    %49 = arith.subf %48, %39 : vector<1x512xf32>
    %50 = vector.extract_strided_slice %5 {offsets = [7, 0], sizes = [1, 512], strides = [1, 1]} : vector<17x512xf32> to vector<1x512xf32>
    %51 = arith.mulf %50, %49 : vector<1x512xf32>
    %52 = arith.addf %47, %51 : vector<1x512xf32>
    %53 = arith.mulf %11, %49 : vector<1x512xf32>
    %54 = arith.subf %53, %44 : vector<1x512xf32>
    %55 = vector.extract_strided_slice %5 {offsets = [8, 0], sizes = [1, 512], strides = [1, 1]} : vector<17x512xf32> to vector<1x512xf32>
    %56 = arith.mulf %55, %54 : vector<1x512xf32>
    %57 = arith.addf %52, %56 : vector<1x512xf32>
    %58 = arith.mulf %11, %54 : vector<1x512xf32>
    %59 = arith.subf %58, %49 : vector<1x512xf32>
    %60 = vector.extract_strided_slice %5 {offsets = [9, 0], sizes = [1, 512], strides = [1, 1]} : vector<17x512xf32> to vector<1x512xf32>
    %61 = arith.mulf %60, %59 : vector<1x512xf32>
    %62 = arith.addf %57, %61 : vector<1x512xf32>
    %63 = arith.mulf %11, %59 : vector<1x512xf32>
    %64 = arith.subf %63, %54 : vector<1x512xf32>
    %65 = vector.extract_strided_slice %5 {offsets = [10, 0], sizes = [1, 512], strides = [1, 1]} : vector<17x512xf32> to vector<1x512xf32>
    %66 = arith.mulf %65, %64 : vector<1x512xf32>
    %67 = arith.addf %62, %66 : vector<1x512xf32>
    %68 = arith.mulf %11, %64 : vector<1x512xf32>
    %69 = arith.subf %68, %59 : vector<1x512xf32>
    %70 = vector.extract_strided_slice %5 {offsets = [11, 0], sizes = [1, 512], strides = [1, 1]} : vector<17x512xf32> to vector<1x512xf32>
    %71 = arith.mulf %70, %69 : vector<1x512xf32>
    %72 = arith.addf %67, %71 : vector<1x512xf32>
    %73 = arith.mulf %11, %69 : vector<1x512xf32>
    %74 = arith.subf %73, %64 : vector<1x512xf32>
    %75 = vector.extract_strided_slice %5 {offsets = [12, 0], sizes = [1, 512], strides = [1, 1]} : vector<17x512xf32> to vector<1x512xf32>
    %76 = arith.mulf %75, %74 : vector<1x512xf32>
    %77 = arith.addf %72, %76 : vector<1x512xf32>
    %78 = arith.mulf %11, %74 : vector<1x512xf32>
    %79 = arith.subf %78, %69 : vector<1x512xf32>
    %80 = vector.extract_strided_slice %5 {offsets = [13, 0], sizes = [1, 512], strides = [1, 1]} : vector<17x512xf32> to vector<1x512xf32>
    %81 = arith.mulf %80, %79 : vector<1x512xf32>
    %82 = arith.addf %77, %81 : vector<1x512xf32>
    %83 = arith.mulf %11, %79 : vector<1x512xf32>
    %84 = arith.subf %83, %74 : vector<1x512xf32>
    %85 = vector.extract_strided_slice %5 {offsets = [14, 0], sizes = [1, 512], strides = [1, 1]} : vector<17x512xf32> to vector<1x512xf32>
    %86 = arith.mulf %85, %84 : vector<1x512xf32>
    %87 = arith.addf %82, %86 : vector<1x512xf32>
    %88 = arith.mulf %11, %84 : vector<1x512xf32>
    %89 = arith.subf %88, %79 : vector<1x512xf32>
    %90 = vector.extract_strided_slice %5 {offsets = [15, 0], sizes = [1, 512], strides = [1, 1]} : vector<17x512xf32> to vector<1x512xf32>
    %91 = arith.mulf %90, %89 : vector<1x512xf32>
    %92 = arith.addf %87, %91 : vector<1x512xf32>
    %c0_11 = arith.constant 0 : index
    %c0_12 = arith.constant 0 : index
    %c0_13 = arith.constant 0 : index
    %93 = vector.load %arg6[%c0_11, %c0_12, %c0_13] : memref<1x1x512xf32, #tpu.memory_space<vmem>>, vector<1x1x512xf32>
    %94 = vector.shape_cast %93 : vector<1x1x512xf32> to vector<1x512xf32>
    %95 = vector.shape_cast %92 : vector<1x512xf32> to vector<1x1x512xf32>
    tpu.vector_store %arg6[%c0_11, %c0_12, %c0_13], %95 {strides = array<i32>} : memref<1x1x512xf32, #tpu.memory_space<vmem>>, vector<1x1x512xf32>,
    return
  }
  func.func @transform_0(%arg0: i32, %arg1: i32) -> (i32, i32, i32) {
    %c0_i32 = arith.constant 0 : i32
    %c0_i32_0 = arith.constant 0 : i32
    return %arg1, %c0_i32, %arg0 : i32, i32, i32
  }
  func.func @transform_1(%arg0: i32, %arg1: i32) -> (i32, i32, i32) {
    %c0_i32 = arith.constant 0 : i32
    %c0_i32_0 = arith.constant 0 : i32
    %c0_i32_1 = arith.constant 0 : i32
    return %arg1, %c0_i32, %c0_i32_0 : i32, i32, i32
  }
  func.func @transform_2(%arg0: i32, %arg1: i32) -> (i32, i32, i32) {
    %c0_i32 = arith.constant 0 : i32
    %c0_i32_0 = arith.constant 0 : i32
    return %arg1, %c0_i32, %arg0 : i32, i32, i32
  }
  func.func @transform_3(%arg0: i32, %arg1: i32) -> (i32, i32) {
    %c0_i32 = arith.constant 0 : i32
    %c0_i32_0 = arith.constant 0 : i32
    return %c0_i32, %arg0 : i32, i32
  }
  func.func @transform_4(%arg0: i32, %arg1: i32) -> (i32, i32, i32) {
    %c0_i32 = arith.constant 0 : i32
    %c0_i32_0 = arith.constant 0 : i32
    return %arg1, %c0_i32, %arg0 : i32, i32, i32
  }
}

</mosaic_0001>

<bundles_post_ra>
// kernel: ddsp_forward.2
= control target key start
LH: loop header
LB: loop body
LE: loop exit
PB: predicated region body
PF: predicated region fallthrough
CT: control target
= control target key end

     0   :  { %v635_v0 = vmov 0   ;;  %v636_v5 = vmov 0.0   ;;  %vm637_vm0 = vmmov 0   ;;  %s638_s21 = smov 16   ;;  %vm260_vm1 = vcmask 130048   ;;  %s846_s1 = inlined_call_operand.vmem [shape: f32[16,1], index: 1, kind: input, shape index: {}]   ;;  %s847_s0 = inlined_call_operand.vmem [shape: f32[16,1], index: 0, kind: input, shape index: {}]   ;;  %s848_s5 = inlined_call_operand.vmem [shape: bf16[128,32], index: 5, kind: input, shape index: {}]   ;;  %s849_s2 = inlined_call_operand.vmem [shape: f32[16,16], index: 2, kind: input, shape index: {}]   ;;  %s850_s3 = inlined_call_operand.vmem [shape: f32[2,128], index: 3, kind: input, shape index: {}]   ;;  %s851_s4 = inlined_call_operand.vmem [shape: f32[1,128], index: 4, kind: input, shape index: {}]   ;;  %s852_s6 = inlined_call_operand.vmem [shape: f32[1,32], index: 6, kind: input, shape index: {}]   ;;  %s853_s7 = inlined_call_operand.vmem [shape: bf16[16,128], index: 7, kind: input, shape index: {}]   ;;  %s854_s10 = inlined_call_operand.vmem [shape: bf16[128,128], index: 10, kind: input, shape index: {}]   ;;  %s855_s8 = inlined_call_operand.vmem [shape: f32[2,128], index: 8, kind: input, shape index: {}]   ;;  %s856_s9 = inlined_call_operand.vmem [shape: f32[1,128], index: 9, kind: input, shape index: {}]   ;;  %s857_s11 = inlined_call_operand.vmem [shape: f32[1,128], index: 11, kind: input, shape index: {}]   ;;  %s858_s12 = inlined_call_operand.vmem [shape: f32[16,128], index: 12, kind: output, shape index: {}]  }
   0x1   :  { %601 = vset.pattern.permute.xlu1 %v635_v0  ;;  %600 = vset.pattern.permute.xlu0 %v635_v0  ;;  %v44_v1 = vld [vmem:[%s846_s1] sm:$0xff]  ;;  %v45_v3 = vld [vmem:[%s846_s1 + $0x8] sm:$0xff]  ;;  %v602_v6 = vld [vmem:[%s848_s5 + $0x38] sm:$0xff]  }
   0x2   :  { %v42_v2 = vld [vmem:[%s847_s0] sm:$0xff]  ;;  %66 = vperm.xlu1 %601, %v44_v1   ;;  %v43_v4 = vld [vmem:[%s847_s0 + $0x8] sm:$0xff]  ;;  %549 = vmatprep.subr.bf16.mxu0 %v636_v5  ;;  %v603_v7 = vld [vmem:[%s848_s5 + $0x30] sm:$0xff]  }
   0x3   :  { %49 = vperm.xlu0 %600, %v42_v2   ;;  %569 = vmatprep.subr.bf16.mxu1 %v636_v5  ;;  %v604_v8 = vld [vmem:[%s848_s5 + $0x28] sm:$0xff]   ;;  %v605_v9 = vld [vmem:[%s848_s5 + $0x20] sm:$0xff]   ;;  %v606_v12 = vld [vmem:[%s848_s5 + $0x18] sm:$0xff]  }
   0x4   :  { %550 = vmatpush3.bf16.msra.mxu0 %v602_v6  ;;  %565 = vmatprep.mubr.msk.bf16.mxu0 %vm637_vm0, %v636_v5  ;;  %v212_v10 = vld [vmem:[%s849_s2] sm:$0xff]  ;;  %v213_v11 = vld [vmem:[%s849_s2 + $0x8] sm:$0xff]  ;;  %v607_v13 = vld [vmem:[%s848_s5 + $0x10] sm:$0xff]  }
   0x5   :  { %551 = vmatprep.subr.bf16.mxu0 %v636_v5  ;;  %571 = vmatprep.mubr.msk.bf16.mxu1 %vm637_vm0, %v636_v5  ;;  %v608_v14 = vld [vmem:[%s848_s5 + $0x8] sm:$0xff]   ;;  %v609_v15 = vld [vmem:[%s848_s5] sm:$0xff]  }
   0x6   :  { %71 = vperm.xlu1 %601, %v45_v3   ;;  %v502_v16 = vld [vmem:[%s850_s3 + $0x1] ss:$0 sm:$0xff]  ;;  %v501_v17 = vld [vmem:[%s850_s3] ss:$0 sm:$0xff] }
   0x7   :  { %54 = vperm.xlu0 %600, %v43_v4   ;;  %v503_v23 = vld [vmem:[%s851_s4] ss:$0 sm:$0xff] }
   0x8   :  { %552 = vmatpush3.bf16.msra.mxu0 %v603_v7  ;;  %v504_v34 = vld [vmem:[%s852_s6] ss:$0 sm:$0xff]  ;;  %s639_s6 = smov 112  }
   0x9   :  { %553 = vmatprep.subr.bf16.mxu0 %v636_v5  ;;  %v610_v45 = vld [vmem:[%s853_s7] sm:$0xff]  }
   0xa   :  { %218 = vrot.lane.b32.xlu1 %v213_v11, %s638_s21  ;;  %570 = vmatpush3.bf16.msra.mxu1 %v610_v45  ;;  %v612_v11 = vld [vmem:[%s854_s10 + $0x30] sm:$0xff]  }
   0xb   :  { %216 = vrot.lane.b32.xlu0 %v212_v10, %s638_s21  ;;  %575 = vmatprep.subr.bf16.mxu1 %v636_v5  ;;  %v611_v10 = vld [vmem:[%s854_s10 + $0x38] sm:$0xff]  }
   0xc   :  { %554 = vmatpush3.bf16.msra.mxu0 %v604_v8 }
   0xd   :  { %555 = vmatprep.subr.bf16.mxu0 %v636_v5 }
  0x10   :  { %556 = vmatpush3.bf16.msra.mxu0 %v605_v9 }
  0x11   :  { %557 = vmatprep.subr.bf16.mxu0 %v636_v5 }
  0x14   :  { %558 = vmatpush3.bf16.msra.mxu0 %v606_v12  ;;  %v613_v12 = vld [vmem:[%s854_s10 + $0x28] sm:$0xff]  }
  0x15   :  { %559 = vmatprep.subr.bf16.mxu0 %v636_v5 }
  0x18   :  { %560 = vmatpush3.bf16.msra.mxu0 %v607_v13  ;;  %v614_v13 = vld [vmem:[%s854_s10 + $0x20] sm:$0xff]  }
  0x19   :  { %561 = vmatprep.subr.bf16.mxu0 %v636_v5 }
  0x1c   :  { %562 = vmatpush3.bf16.msra.mxu0 %v608_v14  ;;  %v615_v14 = vld [vmem:[%s854_s10 + $0x18] sm:$0xff]  }
  0x1d   :  { %563 = vmatprep.subr.bf16.mxu0 %v636_v5 }
  0x20   :  { %564 = vmatpush3.bf16.msra.mxu0 %v609_v15  ;;  %v616_v15 = vld [vmem:[%s854_s10 + $0x10] sm:$0xff]  }
  0x7d   :  { %v766_v18 = vpop.permute.xlu1 %66 }
  0x7e   :  { %v768_v19 = vpop.permute.xlu0 %49  ;;  %v78_v20 = vmul.f32 %v502_v16, %v766_v18 }
  0x7f   :  { %v61_v21 = vmul.f32 %v501_v17, %v768_v19 }
  0x81   :  { %v80_v22 = vadd.f32 %v78_v20, %v61_v21  ;;  %v775_v24 = vpop.permute.xlu1 %71  ;;  %v515_v20 = vld [vmem:[%s855_s8] ss:$0 sm:$0xff]  ;;  %v518_v21 = vld [vmem:[%s855_s8 + $0x1] ss:$0 sm:$0xff] }
  0x82   :  { %v777_v25 = vpop.permute.xlu0 %54  ;;  %v79_v26 = vmul.f32 %v502_v16, %v775_v24  ;;  %v617_v16 = vld [vmem:[%s854_s10 + $0x8] sm:$0xff]  }
  0x83   :  { %v62_v27 = vmul.f32 %v501_v17, %v777_v25  ;;  %v89_v28 = vadd.f32 %v503_v23, %v80_v22  ;;  %v618_v17 = vld [vmem:[%s854_s10] sm:$0xff]   ;;  %v275_v22 = vmul.f32 %v515_v20, %v768_v19 }
  0x85   :  { %v81_v29 = vadd.f32 %v79_v26, %v62_v27  ;;  %v91_v31 = vmax.f32 %v89_v28, 0.0  ;;  %v219_v49 = vpop.permute.xlu1 %218  ;;  %v332_v26 = vmul.f32 %v518_v21, %v766_v18  ;;  %v276_v28 = vmul.f32 %v515_v20, %v777_v25  ;;  %v520_v25 = vld [vmem:[%s857_s11] ss:$0 sm:$0xff] }
  0x86   :  { %v217_v46 = vpop.permute.xlu0 %216 }
  0x87   :  { %v90_v30 = vadd.f32 %v503_v23, %v81_v29 }
  0x89   :  { %v92_v32 = vmax.f32 %v90_v30, 0.0  ;;  %v519_v30 = vld [vmem:[%s856_s9] ss:$0 sm:$0xff] }
  0x8b   :  { %v93_v33 = vpack.c.bf16 %v92_v32, %v91_v31  ;;  %v333_v32 = vmul.f32 %v518_v21, %v775_v24 }
  0x8d   :  { %566 = vmatmul.mubr.bf16.vlgmr.msra.gmra.mxu0 %v93_v33 }
 0x14d   :  { %v199_v35 = vpop.f32.mrf.mxu0 }
 0x14e   :  { %v200_v36 = vadd.f32 %v504_v34, %v199_v35 }
 0x14f   :  { %v567_v37 = vpop.f32.mrf.mxu0 }
 0x150   :  { %v206_v38 = vmul.f32 0.5, %v200_v36  ;;  %v234_v59 = vmul.f32 %v200_v36, %v200_v36 }
 0x151   :  { %v202_v39 = vpop.f32.mrf.mxu0 }
 0x152   :  { %v208_v40 = vmul.f32 1.442695, %v206_v38  ;;  %v203_v41 = vadd.f32 %v504_v34, %v202_v39 }
 0x153   :  { %v568_v42 = vpop.f32.mrf.mxu0 }
 0x154   :  { %619 = vpow2.f32 %v208_v40  ;;  %v207_v43 = vmul.f32 0.5, %v203_v41  ;;  %v235_v0 = vmul.f32 %v203_v41, %v203_v41 }
 0x156   :  { %v210_v44 = vmul.f32 1.442695, %v207_v43 }
 0x158   :  { %621 = vpow2.f32 %v210_v44 }
 0x161   :  { %v620_v47 = vpop.eup %619 }
 0x162   :  { %v222_v48 = vmul.f32 %v620_v47, %v217_v46  ;;  %v236_v52 = vmul.f32 %v620_v47, %v620_v47 }
 0x164   :  { %226 = vrot.lane.b32.xlu0 %v222_v48, %s639_s6 }
 0x165   :  { %v622_v50 = vpop.eup %621 }
 0x166   :  { %v223_v51 = vmul.f32 %v622_v50, %v219_v49  ;;  %v237_v53 = vmul.f32 %v622_v50, %v622_v50 }
 0x168   :  { %228 = vrot.lane.b32.xlu1 %v223_v51, %s639_s6  ;;  %240 = vrot.lane.b32.xlu0 %v236_v52, %s639_s6 }
 0x16c   :  { %242 = vrot.lane.b32.xlu1 %v237_v53, %s639_s6  ;;  %250 = vrot.lane.b32.xlu0 %v200_v36, %s639_s6 }
 0x170   :  { %252 = vrot.lane.b32.xlu1 %v203_v41, %s639_s6 }
 0x1d6   :  { %v227_v54 = vpop.permute.xlu0 %226 }
 0x1d7   :  { %v232_v57 = vadd.f32 %v227_v54, %v200_v36 }
 0x1da   :  { %v229_v55 = vpop.permute.xlu1 %228  ;;  %v241_v56 = vpop.permute.xlu0 %240 }
 0x1db   :  { %v233_v58 = vadd.f32 %v229_v55, %v203_v41  ;;  %v246_v61 = vadd.f32 %v241_v56, %v234_v59 }
 0x1dd   :  { %v267_v60 = vpack.c.bf16 %v233_v58, %v232_v57 }
 0x1de   :  { %v243_v62 = vpop.permute.xlu1 %242  ;;  %v251_v63 = vpop.permute.xlu0 %250 }
 0x1df   :  { %v256_v1 = vsub.f32 %v246_v61, %v251_v63  ;;  %572 = vmatmul.mubr.msk.bf16.vlgmr.msra.gmra.mxu1 %vm260_vm1, %v267_v60  ;;  %v247_v2 = vadd.f32 %v243_v62, %v235_v0 }
 0x1e0   :  { %591 = vmatprep.mubr.msk.bf16.mxu1 %vm637_vm0, %v636_v5  ;;  %576 = vmatpush3.bf16.msra.mxu1 %v611_v10 }
 0x1e1   :  { %v513_v3 = vadd.f32 -1.0, %v256_v1  ;;  %577 = vmatprep.subr.bf16.mxu1 %v636_v5 }
 0x1e2   :  { %v253_v4 = vpop.permute.xlu1 %252 }
 0x1e3   :  { %v257_v6 = vsub.f32 %v247_v2, %v253_v4  ;;  %v261_v7 = vsel %vm260_vm1, %v513_v3, 0.0  ;;  %v490_v4 = vlaneseq }
 0x1e4   :  { %262 = vadd.xlane.f32.xlu0 %v261_v7  ;;  %578 = vmatpush3.bf16.msra.mxu1 %v612_v11 }
 0x1e5   :  { %v514_v8 = vadd.f32 -1.0, %v257_v6  ;;  %579 = vmatprep.subr.bf16.mxu1 %v636_v5  ;;  %v491_v6 = vand.u32 127, %v490_v4 }
 0x1e7   :  { %v264_v9 = vsel %vm260_vm1, %v514_v8, 0.0  ;;  %vm492_vm2 = vcmp.eq.s32.totalorder %v491_v6, 25 }
 0x1e8   :  { %265 = vadd.xlane.f32.xlu1 %v264_v9  ;;  %580 = vmatpush3.bf16.msra.mxu1 %v613_v12 }
 0x1e9   :  { %581 = vmatprep.subr.bf16.mxu1 %v636_v5 }
 0x1ec   :  { %582 = vmatpush3.bf16.msra.mxu1 %v614_v13 }
 0x1ed   :  { %583 = vmatprep.subr.bf16.mxu1 %v636_v5 }
 0x1f0   :  { %584 = vmatpush3.bf16.msra.mxu1 %v615_v14 }
 0x1f1   :  { %585 = vmatprep.subr.bf16.mxu1 %v636_v5 }
 0x1f4   :  { %586 = vmatpush3.bf16.msra.mxu1 %v616_v15 }
 0x1f5   :  { %587 = vmatprep.subr.bf16.mxu1 %v636_v5 }
 0x1f8   :  { %588 = vmatpush3.bf16.msra.mxu1 %v617_v16 }
 0x1f9   :  { %589 = vmatprep.subr.bf16.mxu1 %v636_v5 }
 0x1fc   :  { %590 = vmatpush3.bf16.msra.mxu1 %v618_v17 }
 0x26d   :  { %v263_v11 = vpop.xlane.xlu0 %262 }
 0x271   :  { %v266_v15 = vpop.xlane.xlu1 %265 }
 0x29f   :  { %v320_v23 = vpop.f32.mrf.mxu1 }
 0x2a0   :  { %v321_v27 = vadd.f32 %v320_v23, %v275_v22 }
 0x2a1   :  { %v573_v5 = vpop.f32.mrf.mxu1 }
 0x2a2   :  { %v334_v29 = vadd.f32 %v332_v26, %v321_v27 }
 0x2a3   :  { %v323_v31 = vpop.f32.mrf.mxu1 }
 0x2a4   :  { %v324_v33 = vadd.f32 %v323_v31, %v276_v28  ;;  %v343_v35 = vadd.f32 %v519_v30, %v334_v29 }
 0x2a5   :  { %v574_v34 = vpop.f32.mrf.mxu1 }
 0x2a6   :  { %v335_v36 = vadd.f32 %v333_v32, %v324_v33  ;;  %v345_v37 = vmax.f32 %v343_v35, 0.0 }
 0x2a8   :  { %v344_v19 = vadd.f32 %v519_v30, %v335_v36 }
 0x2aa   :  { %v346_v38 = vmax.f32 %v344_v19, 0.0 }
 0x2ac   :  { %v347_v18 = vpack.c.bf16 %v346_v38, %v345_v37 }
 0x2ae   :  { %592 = vmatmul.mubr.bf16.vlgmr.msra.gmra.mxu1 %v347_v18 }
 0x36e   :  { %v453_v39 = vpop.f32.mrf.mxu1 }
 0x36f   :  { %v454_v40 = vadd.f32 %v520_v25, %v453_v39 }
 0x370   :  { %v593_v41 = vpop.f32.mrf.mxu1 }
 0x371   :  { %v464_v42 = vand.u32 2147483647, %v454_v40  ;;  %v460_v54 = vsub.f32 0.0, %v454_v40 }
 0x372   :  { %v456_v43 = vpop.f32.mrf.mxu1 }
 0x373   :  { %v466_v44 = vsub.f32 0.0, %v464_v42  ;;  %v457_v24 = vadd.f32 %v520_v25, %v456_v43  ;;  %v462_v56 = vmax.f32 %v460_v54, 0.0 }
 0x374   :  { %v594_v45 = vpop.f32.mrf.mxu1 }
 0x375   :  { %v468_v46 = vmul.f32 1.442695, %v466_v44  ;;  %v465_v47 = vand.u32 2147483647, %v457_v24  ;;  %v461_v58 = vsub.f32 0.0, %v457_v24 }
 0x377   :  { %623 = vpow2.f32 %v468_v46  ;;  %v467_v48 = vsub.f32 0.0, %v465_v47  ;;  %v463_v62 = vmax.f32 %v461_v58, 0.0 }
 0x379   :  { %v470_v49 = vmul.f32 1.442695, %v467_v48 }
 0x37b   :  { %625 = vpow2.f32 %v470_v49 }
 0x384   :  { %v624_v50 = vpop.eup %623 }
 0x385   :  { %v472_v51 = vadd.f32 1.0, %v624_v50 }
 0x387   :  { %627 = vlog2.f32 %v472_v51 }
 0x388   :  { %v626_v52 = vpop.eup %625 }
 0x389   :  { %v473_v53 = vadd.f32 1.0, %v626_v52 }
 0x38b   :  { %629 = vlog2.f32 %v473_v53 }
 0x394   :  { %v628_v55 = vpop.eup %627 }
 0x395   :  { %v475_v57 = vmul.f32 0.6931472, %v628_v55 }
 0x397   :  { %v478_v59 = vadd.f32 %v475_v57, %v462_v56 }
 0x398   :  { %v630_v60 = vpop.eup %629 }
 0x399   :  { %v480_v61 = vmul.f32 -2.3025851, %v478_v59  ;;  %v477_v63 = vmul.f32 0.6931472, %v630_v60 }
 0x39b   :  { %v482_v0 = vmul.f32 1.442695, %v480_v61  ;;  %v479_v1 = vadd.f32 %v477_v63, %v463_v62 }
 0x39d   :  { %631 = vpow2.f32 %v482_v0  ;;  %v481_v2 = vmul.f32 -2.3025851, %v479_v1 }
 0x39f   :  { %v484_v3 = vmul.f32 1.442695, %v481_v2 }
 0x3a1   :  { %633 = vpow2.f32 %v484_v3 }
 0x3aa   :  { %v632_v7 = vpop.eup %631 }
 0x3ab   :  { %v486_v8 = vmul.f32 2.0, %v632_v7 }
 0x3ad   :  { %v488_v9 = vadd.f32 1e-07, %v486_v8 }
 0x3ae   :  { %v634_v10 = vpop.eup %633 }
 0x3af   :  { %v493_v12 = vsel %vm492_vm2, %v263_v11, %v488_v9  ;;  %v487_v13 = vmul.f32 2.0, %v634_v10 }
 0x3b0   :  { %495 = vst [vmem:[%s858_s12] sm:$0xff] %v493_v12 }
 0x3b1   :  { %v489_v14 = vadd.f32 1e-07, %v487_v13 }
 0x3b3   :  { %v494_v16 = vsel %vm492_vm2, %v266_v15, %v489_v14 }
 0x3b4   :  { %496 = vst [vmem:[%s858_s12 + $0x8] sm:$0xff] %v494_v16 }

// kernel: ddsp_forward.3
= control target key start
LH: loop header
LB: loop body
LE: loop exit
PB: predicated region body
PF: predicated region fallthrough
CT: control target
= control target key end

     0   :  { %s1617_s15 = smov 0   ;;  %s1619_s16 = smov 0   ;;  %s2225_s0 = inlined_call_operand.vmem [shape: f32[2,1,512], index: 0, kind: input, shape index: {}]   ;;  %s2226_s1 = inlined_call_operand.vmem [shape: f32[2,17,8], index: 1, kind: input, shape index: {}]   ;;  %s2227_s2 = inlined_call_operand.vmem [shape: f32[2,1,512], index: 2, kind: input, shape index: {}]   ;;  %s2228_s3 = inlined_call_operand.vmem [shape: f32[8,512], index: 3, kind: input, shape index: {}]   ;;  %s2229_s4 = inlined_call_operand.vmem [shape: f32[2,1,512], index: 4, kind: output, shape index: {}]  }
   0x1   :  { %s1621_s17 = smov 0  }
   0x2 LB: > { %s23_s18 = sadd.s32 1, %s1578_s16  ;;  %p1498_p0 = scmp.ge.s32.totalorder %s1582_s17, 1  ;;  %s1582_s17 = sphi %s1621_s17, %s14_s17   ;;  %s1578_s16 = sphi %s1619_s16, %s2280_s16   ;;  %s1574_s15 = sphi %s1617_s15, %s2279_s15  }
   0x3   : > { %p24_p1 = scmp.ge.s32.totalorder %s23_s18, 2  ;;  %p219_p2 = scmp.lt.s32.totalorder %s1582_s17, 3 }
   0x5   : > { %s2282_s18 = smov (%p24_p1, %s23_s18), 0  ;;  %p220_p3 = pnand %p1498_p0, %p219_p2 }
   0x6   : > { %p270_p4 = scmp.lt.s32.totalorder (!%p220_p3), %s1574_s15, 1 }
   0x7   : > { %223 = sbr.rel (%p220_p3) target bundleno = 295 (0x127), region = 36 }
   0xc   : > { %v309_v0 = vld [vmem:[%s2228_s3 + $0x8] sm:$0xff]  ;;  %vm328_vm0 = vcmask 1043456   ;;  %v311_v1 = vld [vmem:[%s2228_s3 + $0x18] sm:$0xff]  ;;  %v308_v2 = vld [vmem:[%s2228_s3] sm:$0xff]  ;;  %v1584_v7 = vmov 0   ;;  %s2284_s15 = smov (!%p270_p4, %s1574_s15), 1 }
   0xd   : > { %v313_v3 = vpack.c.bf16 %v309_v0, %v309_v0  ;;  %v315_v4 = vpack.c.bf16 %v311_v1, %v311_v1  ;;  %v312_v5 = vpack.c.bf16 %v308_v2, %v308_v2  ;;  %v310_v6 = vld [vmem:[%s2228_s3 + $0x10] sm:$0xff]  ;;  %373 = vmatprep.mubr.bf16.mxu0 %v1584_v7  ;;  %424 = vmatprep.mubr.bf16.mxu1 %v1584_v7  ;;  %s1519_s27 = smul.u32 24, %s2284_s15  ;;  %s1651_s28 = sshll.u32 %s2284_s15, 2  ;;  %vm321_vm1 = vcmask 64512  }
   0xe   : > { %v314_v8 = vpack.c.bf16 %v310_v6, %v310_v6  ;;  %s276_s5 = scalar_lea.vmem %s2225_s0, %s1651_s28  ;;  %v1585_v28 = vmov 683565275   ;;  %v1586_v30 = vmov 2475754826   ;;  %v1587_v32 = vmov 2131351028   ;;  %s290_s11 = scalar_lea.vmem %s2227_s2, %s1651_s28 }
   0xf   : > { %1503 = vmatprep.subr.msk.bf16.mxu0 %vm328_vm0, %v313_v3  ;;  %1506 = vmatprep.subr.msk.bf16.mxu1 %vm328_vm0, %v315_v4  ;;  %v330_v9 = vsel %vm328_vm0, %v312_v5, 0  ;;  %s282_s8 = scalar_lea.vmem %s2226_s1, %s1519_s27  ;;  %v1660_v11 = vld [vmem:[%s276_s5] sm:$0xf]  ;;  %v1588_v34 = vmov 2102212464   ;;  %s305_s14 = scalar_lea.vmem %s2229_s4, %s1651_s28 }
  0x10   : > { %356 = vmatpush1.bf16.msra.mxu0 %v330_v9  ;;  %v336_v10 = vsel %vm328_vm0, %v314_v8, 0  ;;  %v316_v12 = vld [vmem:[%s282_s8] sm:$0xff]  ;;  %v317_v13 = vld [vmem:[%s282_s8 + $0x8] sm:$0xff]  ;;  %v447_v15 = vand.u32 2139095040, %v1660_v11  ;;  %v318_v17 = vld [vmem:[%s282_s8 + $0x10] sm:$0x1]  ;;  %vm536_vm0 = vweird.f32 %v1660_v11 }
  0x11   : > { %407 = vmatpush1.bf16.msra.mxu1 %v336_v10  ;;  %v319_v14 = vpack.c.bf16 %v317_v13, %v316_v12  ;;  %v444_v18 = vand.u32 2147483647, %v1660_v11  ;;  %v320_v20 = vpack.c.bf16 %v318_v17, %v318_v17  ;;  %v1589_v36 = vmov 920167782  }
  0x12   : > { %v448_v16 = vshrl.u32 %v447_v15, 23  ;;  %v1590_v43 = vmov 1326507024   ;;  %vm446_vm9 = vcmp.lt.s32.totalorder %v1660_v11, 0 }
  0x13   : > { %1504 = vmatmul.mubr.msk.bf16.vlgmr.msra.gmra.mxu0 %vm321_vm1, %v319_v14  ;;  %v451_v22 = vand.u32 8388607, %v444_v18  ;;  %vm445_vm10 = vcmp.le.f32.partialorder %v444_v18, 0.7853982 }
  0x14   : > { %1507 = vmatmul.mubr.msk.bf16.vlgmr.msra.gmra.mxu1 %vm321_vm1, %v319_v14  ;;  %383 = vmatprep.mubr.bf16.mxu0 %v1584_v7  ;;  %v1509_v19 = vadd.s32 4294967169, %v448_v16 }
  0x15   : > { %434 = vmatprep.mubr.bf16.mxu1 %v1584_v7  ;;  %v452_v25 = vor.u32 8388608, %v451_v22 }
  0x16   : > { %v454_v21 = vadd.s32 1, %v1509_v19 }
  0x17   : > { %v492_v45 = vshll.u32 %v452_v25, 8 }
  0x18   : > { %vm455_vm2 = vcmp.gt.s32.totalorder %v454_v21, 0 }
  0x19   : > { %v456_v23 = vsel %vm455_vm2, %v454_v21, 0 }
  0x1a   : > { %v458_v24 = vand.u32 31, %v456_v23  ;;  %v457_v26 = vshrl.u32 %v456_v23, 5 }
  0x1b   : > { %1505 = vmatmul.mubr.msk.bf16.gmra.mxu0 %vm321_vm1, %v320_v20 }
  0x1c   : > { %1508 = vmatmul.mubr.msk.bf16.gmra.mxu1 %vm321_vm1, %v320_v20  ;;  %v459_v27 = vsub.s32 32, %v458_v24  ;;  %v461_v29 = vshll.u32 %v1585_v28, %v458_v24  ;;  %v464_v31 = vshll.u32 %v1586_v30, %v458_v24  ;;  %v467_v33 = vshll.u32 %v1587_v32, %v458_v24 }
  0x1d   : > { %v470_v35 = vshll.u32 %v1588_v34, %v458_v24  ;;  %v473_v37 = vshll.u32 %v1589_v36, %v458_v24  ;;  %vm476_vm3 = vcmp.lt.s32.totalorder %v457_v26, 1  ;;  %vm479_vm4 = vcmp.lt.s32.totalorder %v457_v26, 4 }
  0x1e   : > { %v460_v38 = vshrl.u32 %v1585_v28, %v459_v27  ;;  %v462_v39 = vshrl.u32 %v1586_v30, %v459_v27  ;;  %v465_v40 = vshrl.u32 %v1587_v32, %v459_v27  ;;  %v468_v41 = vshrl.u32 %v1588_v34, %v459_v27 }
  0x1f   : > { %v471_v42 = vshrl.u32 %v1589_v36, %v459_v27  ;;  %v474_v44 = vshrl.u32 %v1590_v43, %v459_v27  ;;  %vm477_vm5 = vcmp.lt.s32.totalorder %v457_v26, 2  ;;  %vm478_vm6 = vcmp.lt.s32.totalorder %v457_v26, 3 }
  0x20   : > { %v463_v46 = vor.u32 %v462_v39, %v461_v29  ;;  %v466_v47 = vor.u32 %v465_v40, %v464_v31  ;;  %v469_v48 = vor.u32 %v468_v41, %v467_v33 }
  0x21   : > { %v472_v49 = vor.u32 %v471_v42, %v470_v35  ;;  %v475_v50 = vor.u32 %v474_v44, %v473_v37 }
  0x22   : > { %v480_v51 = vsel %vm476_vm3, %v460_v38, %v463_v46  ;;  %v481_v52 = vsel %vm479_vm4, %v469_v48, 2102212464  ;;  %v484_v53 = vsel %vm476_vm3, %v463_v46, %v466_v47  ;;  %v488_v54 = vsel %vm476_vm3, %v466_v47, %v469_v48 }
  0x23   : > { %v482_v55 = vsel %vm478_vm6, %v466_v47, %v481_v52  ;;  %v485_v56 = vsel %vm479_vm4, %v472_v49, 920167782  ;;  %v489_v57 = vsel %vm479_vm4, %v475_v50, 1326507024 }
  0x24   : > { %v486_v58 = vsel %vm478_vm6, %v469_v48, %v485_v56  ;;  %v490_v59 = vsel %vm478_vm6, %v472_v49, %v489_v57  ;;  %v483_v60 = vsel %vm477_vm5, %v480_v51, %v482_v55 }
  0x25   : > { %v487_v61 = vsel %vm477_vm5, %v484_v53, %v486_v58  ;;  %v491_v62 = vsel %vm477_vm5, %v488_v54, %v490_v59  ;;  %v499_v3 = vmul.u32 %v492_v45, %v483_v60 }
  0x26   : > { %v1670_v63 = vmul.u32.u64.low %v492_v45, %v491_v62  ;;  %v1671_v0 = vmul.u32.u64.high %v492_v45, %v491_v62, %v1670_v63  ;;  %v1673_v1 = vmul.u32.u64.low %v492_v45, %v487_v61  ;;  %v1674_v2 = vmul.u32.u64.high %v492_v45, %v487_v61, %v1673_v1 }
  0x28   : > { %vm501_vm7 = vc.u32 %v1671_v0, %v1673_v1  ;;  %v502_v4 = vadd.s32 1, %v1674_v2  ;;  %v500_v16 = vadd.s32 %v1673_v1, %v1671_v0 }
  0x2a   : > { %v503_v5 = vsel %vm501_vm7, %v502_v4, %v1674_v2 }
  0x2b   : > { %v504_v6 = vadd.s32 %v503_v5, %v499_v3 }
  0x2d   : > { %v505_v7 = vadd.s32 536870912, %v504_v6 }
  0x2f   : > { %v506_v8 = vshrl.u32 %v505_v7, 30  ;;  %v2230_v7 = vlaneseq }
  0x31   : > { %v507_v9 = vshll.u32 %v506_v8, 30  ;;  %v530_v33 = vsub.s32 4, %v506_v8 }
  0x33   : > { %v508_v10 = vsub.s32 %v504_v6, %v507_v9  ;;  %v531_v34 = vsel %vm446_vm9, %v530_v33, %v506_v8  ;;  %v1746_v9 = vshrl.u32 %v2230_v7, 7 }
  0x34   : > { %v533_v35 = vsel %vm445_vm10, 0, %v531_v34 }
  0x35   : > { %v510_v12 = vsub.s32 0, %v508_v10  ;;  %v537_v36 = vadd.s32 3, %v533_v35  ;;  %v641_v37 = vand.u32 3, %v533_v35 }
  0x37   : > { %v1510_v13 = vmin.u32 %v510_v12, %v508_v10  ;;  %v538_v41 = vand.u32 3, %v537_v36  ;;  %vm643_vm11 = vcmp.eq.s32.totalorder %v641_v37, 0  ;;  %vm646_vm12 = vcmp.eq.s32.totalorder %v641_v37, 2 }
  0x38   : > { %vm642_vm13 = vcmp.lt.s32.totalorder %v641_v37, 2  ;;  %v1756_v12 = vsub.s32 0, %v1746_v9 }
  0x39   : > { %v512_v14 = vclz %v1510_v13  ;;  %vm540_vm14 = vcmp.eq.s32.totalorder %v538_v41, 0  ;;  %vm543_vm15 = vcmp.eq.s32.totalorder %v538_v41, 2  ;;  %vm539_vm1 = vcmp.lt.s32.totalorder %v538_v41, 2 }
  0x3a   : > { %v1759_v13 = vsub.s32 2, %v1746_v9 }
  0x3b   : > { %v1511_v15 = vadd.s32 4294967294, %v512_v14  ;;  %v1762_v14 = vsub.s32 1, %v1746_v9 }
  0x3d   : > { %vm1512_vm8 = vcmp.lt.s32.totalorder %v1511_v15, 0 }
  0x3e   : > { %v515_v17 = vsel %vm1512_vm8, 0, %v1511_v15  ;;  %v1764_v15 = vld [vmem:[%s290_s11] sm:$0xf] }
  0x3f   : > { %v516_v19 = vsub.s32 32, %v515_v17  ;;  %v517_v20 = vshll.u32 %v508_v10, %v515_v17  ;;  %v520_v21 = vsub.s32 4294967266, %v515_v17  ;;  %v1769_v17 = vsub.s32 3, %v1746_v9 }
  0x41   : > { %v518_v22 = vshrl.u32 %v500_v16, %v516_v19  ;;  %v521_v23 = vadd.s32 127, %v520_v21 }
  0x43   : > { %v519_v24 = vor.u32 %v518_v22, %v517_v20  ;;  %v522_v25 = vshll.u32 %v521_v23, 23  ;;  %v682_v20 = vrot.slane %v1764_v15, %v1756_v12  ;;  %v690_v22 = vrot.slane %v1764_v15, %v1759_v13 }
  0x45   : > { %v523_v26 = vor.u32 4788187, %v522_v25  ;;  %v526_v27 = vcvt.s32.f32 %v519_v24  ;;  %v1591_v25 = vmov 1966171168  }
  0x47   : > { %v524_v28 = vand.u32 2147483647, %v523_v26 }
  0x49   : > { %v527_v29 = vmul.f32 %v526_v27, %v524_v28 }
  0x4b   : > { %v528_v30 = vxor.u32 2147483648, %v527_v29 }
  0x4d   : > { %v529_v31 = vsel %vm446_vm9, %v528_v30, %v527_v29 }
  0x4e   : > { %v532_v32 = vsel %vm445_vm10, %v1660_v11, %v529_v31 }
  0x4f   : > { %1556 = vcosq.f32 %v532_v32 }
  0x50   : > { %1558 = vsinq.f32 %v532_v32 }
  0x5c   : > { %v1557_v38 = vpop.eup %1556 }
  0x5d   : > { %v1559_v39 = vpop.eup %1558  ;;  %v544_v40 = vxor.u32 2147483648, %v1557_v38 }
  0x5e   : > { %v541_v42 = vxor.u32 2147483648, %v1559_v39 }
  0x5f   : > { %v648_v43 = vsel %vm646_vm12, %v544_v40, %v1559_v39  ;;  %v545_v46 = vsel %vm543_vm15, %v544_v40, %v1559_v39 }
  0x60   : > { %v645_v18 = vsel %vm643_vm11, %v1557_v38, %v541_v42  ;;  %v542_v45 = vsel %vm540_vm14, %v1557_v38, %v541_v42 }
  0x61   : > { %v649_v44 = vsel %vm642_vm13, %v645_v18, %v648_v43  ;;  %v546_v48 = vsel %vm539_vm1, %v542_v45, %v545_v46 }
  0x62   : > { %v650_v47 = vsel %vm536_vm0, nan, %v649_v44  ;;  %v1687_v50 = vsel %vm536_vm0, nan, %v546_v48  ;;  %v1902_v48 = vunpack.c.l.s4 %v1591_v25 }
  0x63   : > { %v1685_v49 = vmul.f32 2.0, %v650_v47  ;;  %v656_v19 = vrot.slane %v1687_v50, %v1756_v12  ;;  %v664_v21 = vrot.slane %v1687_v50, %v1759_v13 }
  0x65   : > { %v1691_v51 = vmul.f32 %v1685_v49, %v1687_v50 }
  0x67   : > { %v749_v52 = vmul.f32 %v1691_v51, %v1685_v49  ;;  %v712_v23 = vrot.slane %v1691_v51, %v1756_v12  ;;  %v720_v24 = vrot.slane %v1691_v51, %v1759_v13 }
  0x69   : > { %v1696_v53 = vsub.f32 %v749_v52, %v1687_v50 }
  0x6b   : > { %v792_v11 = vmul.f32 %v1696_v53, %v1685_v49  ;;  %v755_v27 = vrot.slane %v1696_v53, %v1756_v12  ;;  %v763_v29 = vrot.slane %v1696_v53, %v1759_v13 }
  0x6d   : > { %v1701_v54 = vsub.f32 %v792_v11, %v1691_v51 }
  0x6f   : > { %v835_v55 = vmul.f32 %v1701_v54, %v1685_v49  ;;  %v798_v31 = vrot.slane %v1701_v54, %v1756_v12  ;;  %v806_v32 = vrot.slane %v1701_v54, %v1759_v13 }
  0x71   : > { %v1706_v56 = vsub.f32 %v835_v55, %v1696_v53 }
  0x73   : > { %v878_v57 = vmul.f32 %v1706_v56, %v1685_v49  ;;  %v841_v41 = vrot.slane %v1706_v56, %v1756_v12 }
  0x75   : > { %v1711_v58 = vsub.f32 %v878_v57, %v1701_v54 }
  0x77   : > { %v921_v59 = vmul.f32 %v1711_v58, %v1685_v49  ;;  %v884_v46 = vrot.slane %v1711_v58, %v1756_v12 }
  0x79   : > { %v1716_v60 = vsub.f32 %v921_v59, %v1706_v56 }
  0x7b   : > { %v964_v61 = vmul.f32 %v1716_v60, %v1685_v49  ;;  %v927_v11 = vrot.slane %v1716_v60, %v1756_v12 }
  0x7d   : > { %v1721_v62 = vsub.f32 %v964_v61, %v1711_v58 }
  0x7f   : > { %v1007_v63 = vmul.f32 %v1721_v62, %v1685_v49 }
  0x81   : > { %v1726_v0 = vsub.f32 %v1007_v63, %v1716_v60 }
  0x83   : > { %v1038_v1 = vmul.f32 %v1726_v0, %v1685_v49 }
  0x85   : > { %v1731_v2 = vsub.f32 %v1038_v1, %v1721_v62  ;;  %v970_v1 = vrot.slane %v1721_v62, %v1756_v12 }
  0x87   : > { %v1081_v3 = vmul.f32 %v1731_v2, %v1685_v49  ;;  %v1052_v52 = vrot.slane %v1731_v2, %v1759_v13 }
  0x89   : > { %v1736_v4 = vsub.f32 %v1081_v3, %v1726_v0 }
  0x8b   : > { %v1124_v5 = vmul.f32 %v1736_v4, %v1685_v49 }
  0x8d   : > { %v1741_v6 = vsub.f32 %v1124_v5, %v1731_v2  ;;  %v1044_v5 = vrot.slane %v1731_v2, %v1756_v12 }
  0x8f   : > { %v1167_v8 = vmul.f32 %v1741_v6, %v1685_v49  ;;  %v1130_v55 = vrot.slane %v1741_v6, %v1756_v12  ;;  %v1138_v30 = vrot.slane %v1741_v6, %v1759_v13 }
  0x91   : > { %v1753_v10 = vsub.f32 %v1167_v8, %v1736_v4 }
  0x93   : > { %v1210_v16 = vmul.f32 %v1753_v10, %v1685_v49 }
  0x95   : > { %v1790_v28 = vsub.f32 %v1210_v16, %v1741_v6  ;;  %v1013_v16 = vrot.slane %v1726_v0, %v1756_v12 }
  0x97   : > { %v1253_v47 = vmul.f32 %v1790_v28, %v1685_v49 }
  0x99   : > { %v1871_v8 = vsub.f32 %v1253_v47, %v1753_v10  ;;  %v1087_v47 = vrot.slane %v1736_v4, %v1756_v12 }
  0x9b   : > { %v1296_v34 = vmul.f32 %v1871_v8, %v1685_v49  ;;  %v1173_v49 = vrot.slane %v1753_v10, %v1756_v12 }
  0x9d   : > { %v1927_v25 = vsub.f32 %v1296_v34, %v1790_v28 }
  0xd3   : > { %v1804_v35 = vpop.f32.mrf.mxu0 }
  0xd4   : > { %v1806_v36 = vpop.f32.mrf.mxu1  ;;  %v729_v59 = vmul.f32 %v712_v23, %v1804_v35  ;;  %v673_v18 = vmul.f32 %v656_v19, %v1804_v35  ;;  %v772_v38 = vmul.f32 %v755_v27, %v1804_v35  ;;  %v987_v42 = vmul.f32 %v970_v1, %v1804_v35 }
  0xd5   : > { %v1824_v44 = vpop.f32.mrf.mxu0 }
  0xd6   : > { %v1826_v45 = vpop.f32.mrf.mxu1  ;;  %v737_v27 = vrot.slane %v729_v59, 1 }
  0xd7   : > { %v1844_v61 = vpop.f32.mrf.mxu0 }
  0xd8   : > { %v1846_v63 = vpop.f32.mrf.mxu1 }
  0xd9   : > { %v1864_v40 = vpop.f32.mrf.mxu0 }
  0xda   : > { %v1866_v39 = vpop.f32.mrf.mxu1 }
  0xdb   : > { %v385_v33 = vpop.f32.mrf.mxu0 }
  0xdc   : > { %v436_v23 = vpop.f32.mrf.mxu1  ;;  %v699_v3 = vmul.f32 %v682_v20, %v385_v33  ;;  %v815_v33 = vmul.f32 %v798_v31, %v1804_v35  ;;  %v858_v31 = vmul.f32 %v841_v41, %v1804_v35  ;;  %v901_v41 = vmul.f32 %v884_v46, %v1804_v35 }
  0xdd   : > { %v1900_v37 = vpop.f32.mrf.mxu0  ;;  %v995_v46 = vrot.slane %v987_v42, 7  ;;  %v701_v1 = vmul.f32 %v690_v22, %v436_v23  ;;  %v774_v42 = vmul.f32 %v763_v29, %v1806_v36  ;;  %v817_v22 = vmul.f32 %v806_v32, %v1806_v36 }
  0xde   : > { %v1904_v19 = vpop.f32.mrf.mxu1  ;;  %v703_v20 = vadd.f32 %v699_v3, %v673_v18  ;;  %v780_v3 = vrot.slane %v772_v38, 2 }
  0xdf   : > { %v389_v43 = vpop.f32.mrf.mxu0 }
  0xe0   : > { %v440_v18 = vpop.f32.mrf.mxu1  ;;  %v745_v59 = vadd.f32 %v737_v27, %v703_v20  ;;  %v823_v27 = vrot.slane %v815_v33, 3 }
  0xe1   : > { %v390_v43 = vpop.f32.mrf.mxu0  ;;  %v944_v18 = vmul.f32 %v927_v11, %v1804_v35  ;;  %v1030_v35 = vmul.f32 %v1013_v16, %v1844_v61 }
  0xe2   : > { %v441_v20 = vpop.f32.mrf.mxu1  ;;  %v788_v38 = vadd.f32 %v780_v3, %v745_v59  ;;  %v866_v3 = vrot.slane %v858_v31, 4  ;;  %v909_v31 = vrot.slane %v901_v41, 5  ;;  %v731_v41 = vmul.f32 %v720_v24, %v1806_v36 }
  0xe3   : > { %v675_v20 = vmul.f32 %v664_v21, %v1806_v36  ;;  %v1061_v21 = vmul.f32 %v1044_v5, %v1844_v61  ;;  %v1987_v24 = vmul.f32 %v1052_v52, %v1846_v63  ;;  %v1993_v5 = vmul.f32 %v1087_v47, %v1844_v61 }
  0xe4   : > { %v831_v59 = vadd.f32 %v823_v27, %v788_v38  ;;  %v952_v27 = vrot.slane %v944_v18, 6  ;;  %v739_v23 = vrot.slane %v731_v41, 1  ;;  %v2005_v52 = vmul.f32 %v1138_v30, %v1846_v63 }
  0xe5   : > { %v705_v16 = vadd.f32 %v701_v1, %v675_v20  ;;  %v2232_v20 = vrot.slane %v1706_v56, %v1759_v13  ;;  %v2234_v30 = vrot.slane %v1731_v2, %v1769_v17 }
  0xe6   : > { %v874_v38 = vadd.f32 %v866_v3, %v831_v59  ;;  %v2231_v59 = vrot.slane %v1736_v4, %v1759_v13  ;;  %v2002_v3 = vmul.f32 %v1130_v55, %v1844_v61 }
  0xe7   : > { %v747_v47 = vadd.f32 %v739_v23, %v705_v16  ;;  %v860_v1 = vmul.f32 %v2232_v20, %v1806_v36  ;;  %v2024_v55 = vmul.f32 %v2234_v30, %v1866_v39  ;;  %v2236_v23 = vrot.slane %v1687_v50, %v1762_v14 }
  0xe8   : > { %v917_v18 = vadd.f32 %v909_v31, %v874_v38  ;;  %v1999_v32 = vmul.f32 %v2231_v59, %v1846_v63  ;;  %v2008_v38 = vmul.f32 %v1173_v49, %v1844_v61  ;;  %v782_v31 = vrot.slane %v774_v42, 2 }
  0xe9   : > { %v825_v49 = vrot.slane %v817_v22, 3  ;;  %v674_v59 = vmul.f32 %v2236_v23, %v1824_v44  ;;  %v2237_v20 = vrot.slane %v1764_v15, %v1762_v14  ;;  %v868_v11 = vrot.slane %v860_v1, 4 }
  0xea   : > { %v960_v29 = vadd.f32 %v952_v27, %v917_v18  ;;  %v2233_v27 = vrot.slane %v1731_v2, %v1762_v14  ;;  %v2235_v18 = vrot.slane %v1711_v58, %v1759_v13  ;;  %v790_v16 = vadd.f32 %v782_v31, %v747_v47 }
  0xeb   : > { %v2238_v2 = vrot.slane %v1691_v51, %v1762_v14  ;;  %v2239_v47 = vrot.slane %v1716_v60, %v1759_v13 }
  0xec   : > { %v2018_v41 = vmul.f32 %v2233_v27, %v1864_v40  ;;  %v903_v42 = vmul.f32 %v2235_v18, %v1806_v36  ;;  %v700_v27 = vmul.f32 %v2237_v20, %v1900_v37  ;;  %v1003_v30 = vadd.f32 %v995_v46, %v960_v29 }
  0xed   : > { %v730_v22 = vmul.f32 %v2238_v2, %v1824_v44  ;;  %v946_v31 = vmul.f32 %v2239_v47, %v1806_v36  ;;  %v2240_v18 = vrot.slane %v1696_v53, %v1762_v14  ;;  %v2241_v37 = vrot.slane %v1701_v54, %v1762_v14 }
  0xee   : > { %v833_v34 = vadd.f32 %v825_v49, %v790_v16  ;;  %v704_v43 = vadd.f32 %v700_v27, %v674_v59  ;;  %v1069_v46 = vrot.slane %v1061_v21, 1  ;;  %v1071_v29 = vrot.slane %v1987_v24, 1 }
  0xef   : > { %v773_v23 = vmul.f32 %v2240_v18, %v1824_v44  ;;  %v816_v20 = vmul.f32 %v2241_v37, %v1824_v44  ;;  %v738_v2 = vrot.slane %v730_v22, 1  ;;  %v2242_v47 = vrot.slane %v1721_v62, %v1759_v13 }
  0xf0   : > { %v2243_v18 = vrot.slane %v1706_v56, %v1762_v14  ;;  %v876_v7 = vadd.f32 %v868_v11, %v833_v34  ;;  %v911_v26 = vrot.slane %v903_v42, 5  ;;  %v1034_v1 = vadd.f32 %v1030_v35, %v1003_v30 }
  0xf1   : > { %v989_v57 = vmul.f32 %v2242_v47, %v1806_v36  ;;  %v746_v37 = vadd.f32 %v738_v2, %v704_v43  ;;  %v781_v49 = vrot.slane %v773_v23, 2  ;;  %v954_v16 = vrot.slane %v946_v31, 6 }
  0xf2   : > { %v859_v33 = vmul.f32 %v2243_v18, %v1824_v44  ;;  %v824_v59 = vrot.slane %v816_v20, 3  ;;  %v2244_v21 = vrot.slane %v1711_v58, %v1762_v14  ;;  %v919_v27 = vadd.f32 %v911_v26, %v876_v7 }
  0xf3   : > { %v789_v22 = vadd.f32 %v781_v49, %v746_v37  ;;  %v2245_v36 = vrot.slane %v1687_v50, %v1769_v17  ;;  %v2246_v34 = vrot.slane %v1764_v15, %v1769_v17  ;;  %v997_v35 = vrot.slane %v989_v57, 7 }
  0xf4   : > { %v902_v24 = vmul.f32 %v2244_v21, %v1824_v44  ;;  %v867_v11 = vrot.slane %v859_v33, 4  ;;  %v2247_v42 = vrot.slane %v1691_v51, %v1769_v17  ;;  %v2248_v7 = vrot.slane %v1696_v53, %v1769_v17 }
  0xf5   : > { %v676_v47 = vmul.f32 %v2245_v36, %v1826_v45  ;;  %v702_v43 = vmul.f32 %v2246_v34, %v1904_v19  ;;  %v962_v31 = vadd.f32 %v954_v16, %v919_v27  ;;  %v832_v50 = vadd.f32 %v824_v59, %v789_v22 }
  0xf6   : > { %v732_v30 = vmul.f32 %v2247_v42, %v1826_v45  ;;  %v775_v26 = vmul.f32 %v2248_v7, %v1826_v45  ;;  %v2249_v23 = vrot.slane %v1716_v60, %v1762_v14  ;;  %v1077_v57 = vadd.f32 %v1069_v46, %v1034_v1 }
  0xf7   : > { %v706_v19 = vadd.f32 %v702_v43, %v676_v47  ;;  %v2250_v33 = vrot.slane %v1726_v0, %v1759_v13  ;;  %v2251_v53 = vrot.slane %v1701_v54, %v1769_v17  ;;  %v1005_v18 = vadd.f32 %v997_v35, %v962_v31 }
  0xf8   : > { %v945_v15 = vmul.f32 %v2249_v23, %v1824_v44  ;;  %v740_v20 = vrot.slane %v732_v30, 1  ;;  %v875_v37 = vadd.f32 %v867_v11, %v832_v50  ;;  %v910_v49 = vrot.slane %v902_v24, 5 }
  0xf9   : > { %v1032_v51 = vmul.f32 %v2250_v33, %v1846_v63  ;;  %v818_v2 = vmul.f32 %v2251_v53, %v1826_v45  ;;  %v2252_v16 = vrot.slane %v1721_v62, %v1762_v14  ;;  %v2253_v46 = vrot.slane %v1736_v4, %v1762_v14 }
  0xfa   : > { %v748_v21 = vadd.f32 %v740_v20, %v706_v19  ;;  %v783_v27 = vrot.slane %v775_v26, 2  ;;  %v2254_v54 = vrot.slane %v1706_v56, %v1769_v17  ;;  %v1112_v36 = vrot.slane %v1993_v5, 2 }
  0xfb   : > { %v988_v59 = vmul.f32 %v2252_v16, %v1824_v44  ;;  %v1105_v1 = vmul.f32 %v2253_v46, %v1864_v40  ;;  %v1036_v24 = vadd.f32 %v1032_v51, %v1005_v18  ;;  %v918_v47 = vadd.f32 %v910_v49, %v875_v37 }
  0xfc   : > { %v861_v22 = vmul.f32 %v2254_v54, %v1826_v45  ;;  %v953_v34 = vrot.slane %v945_v15, 6  ;;  %v2255_v44 = vrot.slane %v1736_v4, %v1769_v17  ;;  %v791_v35 = vadd.f32 %v783_v27, %v748_v21 }
  0xfd   : > { %v826_v11 = vrot.slane %v818_v2, 3  ;;  %v2256_v42 = vrot.slane %v1711_v58, %v1769_v17  ;;  %v1114_v56 = vrot.slane %v1999_v32, 2  ;;  %v1120_v7 = vadd.f32 %v1112_v36, %v1077_v57 }
  0xfe   : > { %v2112_v43 = vmul.f32 %v2255_v44, %v1866_v39  ;;  %v961_v5 = vadd.f32 %v953_v34, %v918_v47  ;;  %v996_v26 = vrot.slane %v988_v59, 7  ;;  %v1079_v31 = vadd.f32 %v1071_v29, %v1036_v24 }
  0xff   : > { %v904_v30 = vmul.f32 %v2256_v42, %v1826_v45  ;;  %v834_v50 = vadd.f32 %v826_v11, %v791_v35  ;;  %v869_v23 = vrot.slane %v861_v22, 4  ;;  %v2257_v4 = vrot.slane %v1716_v60, %v1769_v17 }
 0x100   : > { %v1070_v19 = vrot.slane %v2018_v41, 1  ;;  %v1072_v33 = vrot.slane %v2024_v55, 1  ;;  %v1004_v51 = vadd.f32 %v996_v26, %v961_v5  ;;  %v2258_v58 = vrot.slane %v1726_v0, %v1762_v14 }
 0x101   : > { %v947_v15 = vmul.f32 %v2257_v4, %v1826_v45  ;;  %v1155_v57 = vrot.slane %v2002_v3, 3  ;;  %v877_v29 = vadd.f32 %v869_v23, %v834_v50  ;;  %v912_v20 = vrot.slane %v904_v30, 5 }
 0x102   : > { %v1031_v32 = vmul.f32 %v2258_v58, %v1864_v40  ;;  %v2259_v53 = vrot.slane %v1721_v62, %v1769_v17  ;;  %v1113_v2 = vrot.slane %v1105_v1, 2  ;;  %v1115_v41 = vrot.slane %v2112_v43, 2 }
 0x103   : > { %v2260_v55 = vrot.slane %v1741_v6, %v1762_v14  ;;  %v1163_v49 = vadd.f32 %v1155_v57, %v1120_v7  ;;  %v1122_v16 = vadd.f32 %v1114_v56, %v1079_v31  ;;  %v920_v59 = vadd.f32 %v912_v20, %v877_v29 }
 0x104   : > { %v990_v60 = vmul.f32 %v2259_v53, %v1826_v45  ;;  %v1035_v37 = vadd.f32 %v1031_v32, %v1004_v51  ;;  %v955_v3 = vrot.slane %v947_v15, 6  ;;  %v1157_v46 = vrot.slane %v2005_v52, 3 }
 0x105   : > { %v1148_v18 = vmul.f32 %v2260_v55, %v1864_v40  ;;  %v2261_v62 = vrot.slane %v1753_v10, %v1762_v14  ;;  %v2262_v1 = vrot.slane %v1753_v10, %v1759_v13  ;;  %v1198_v54 = vrot.slane %v2008_v38, 4 }
 0x106   : > { %v1078_v27 = vadd.f32 %v1070_v19, %v1035_v37  ;;  %v2263_v22 = vrot.slane %v1790_v28, %v1756_v12  ;;  %v963_v24 = vadd.f32 %v955_v3, %v920_v59  ;;  %v998_v52 = vrot.slane %v990_v60, 7 }
 0x107   : > { %v1191_v45 = vmul.f32 %v2261_v62, %v1864_v40  ;;  %v1192_v21 = vmul.f32 %v2262_v1, %v1846_v63  ;;  %v2264_v47 = vrot.slane %v1741_v6, %v1769_v17  ;;  %v1156_v44 = vrot.slane %v1148_v18, 3 }
 0x108   : > { %v1233_v36 = vmul.f32 %v2263_v22, %v1844_v61  ;;  %v2265_v43 = vrot.slane %v1790_v28, %v1762_v14  ;;  %v1121_v11 = vadd.f32 %v1113_v2, %v1078_v27  ;;  %v1206_v38 = vadd.f32 %v1198_v54, %v1163_v49 }
 0x109   : > { %v1150_v34 = vmul.f32 %v2264_v47, %v1866_v39  ;;  %v1165_v42 = vadd.f32 %v1157_v46, %v1122_v16  ;;  %v1006_v30 = vadd.f32 %v998_v52, %v963_v24  ;;  %v2266_v56 = vrot.slane %v1726_v0, %v1769_v17 }
 0x10a   : > { %v1234_v35 = vmul.f32 %v2265_v43, %v1864_v40  ;;  %v1199_v5 = vrot.slane %v1191_v45, 4  ;;  %v1200_v26 = vrot.slane %v1192_v21, 4  ;;  %v2267_v6 = vrot.slane %v1871_v8, %v1762_v14 }
 0x10b   : > { %v1033_v7 = vmul.f32 %v2266_v56, %v1866_v39  ;;  %v1164_v50 = vadd.f32 %v1156_v44, %v1121_v11  ;;  %v2268_v23 = vrot.slane %v1790_v28, %v1759_v13  ;;  %v1241_v15 = vrot.slane %v1233_v36, 5 }
 0x10c   : > { %v1277_v31 = vmul.f32 %v2267_v6, %v1864_v40  ;;  %v2269_v19 = vrot.slane %v1871_v8, %v1756_v12  ;;  %v1158_v58 = vrot.slane %v1150_v34, 3  ;;  %v2270_v32 = vrot.slane %v1753_v10, %v1769_v17 }
 0x10d   : > { %v1235_v4 = vmul.f32 %v2268_v23, %v1846_v63  ;;  %v1037_v51 = vadd.f32 %v1033_v7, %v1006_v30  ;;  %v1242_v29 = vrot.slane %v1234_v35, 5  ;;  %v1207_v20 = vadd.f32 %v1199_v5, %v1164_v50 }
 0x10e   : > { %v1276_v0 = vmul.f32 %v2269_v19, %v1844_v61  ;;  %v1193_v57 = vmul.f32 %v2270_v32, %v1866_v39  ;;  %v1249_v53 = vadd.f32 %v1241_v15, %v1206_v38  ;;  %v2271_v60 = vrot.slane %v1927_v25, %v1762_v14 }
 0x10f   : > { %v1208_v55 = vadd.f32 %v1200_v26, %v1165_v42  ;;  %v1080_v18 = vadd.f32 %v1072_v33, %v1037_v51  ;;  %v2272_v37 = vrot.slane %v1790_v28, %v1769_v17  ;;  %v2273_v10 = vrot.slane %v1871_v8, %v1759_v13 }
 0x110   : > { %v1320_v2 = vmul.f32 %v2271_v60, %v1864_v40  ;;  %v1285_v59 = vrot.slane %v1277_v31, 6  ;;  %v1250_v3 = vadd.f32 %v1242_v29, %v1207_v20  ;;  %v1243_v46 = vrot.slane %v1235_v4, 5 }
 0x111   : > { %v1236_v49 = vmul.f32 %v2272_v37, %v1866_v39  ;;  %v1278_v16 = vmul.f32 %v2273_v10, %v1846_v63  ;;  %v1284_v62 = vrot.slane %v1276_v0, 6  ;;  %v2274_v14 = vrot.slane %v1927_v25, %v1756_v12 }
 0x112   : > { %v1123_v33 = vadd.f32 %v1115_v41, %v1080_v18  ;;  %v1201_v45 = vrot.slane %v1193_v57, 4  ;;  %v2275_v28 = vrot.slane %v1871_v8, %v1769_v17  ;;  %v1293_v21 = vadd.f32 %v1285_v59, %v1250_v3 }
 0x113   : > { %v1319_v40 = vmul.f32 %v2274_v14, %v1844_v61  ;;  %v1292_v27 = vadd.f32 %v1284_v62, %v1249_v53  ;;  %v1328_v54 = vrot.slane %v1320_v2, 7  ;;  %v1251_v22 = vadd.f32 %v1243_v46, %v1208_v55 }
 0x114   : > { %v1279_v1 = vmul.f32 %v2275_v28, %v1866_v39  ;;  %v1166_v36 = vadd.f32 %v1158_v58, %v1123_v33  ;;  %v1244_v24 = vrot.slane %v1236_v49, 5  ;;  %v1286_v52 = vrot.slane %v1278_v16, 6 }
 0x115   : > { %v2276_v47 = vrot.slane %v1927_v25, %v1759_v13  ;;  %v1347_v61 = vunpack.c.0.s8 %v1902_v48  ;;  %v2277_v41 = vrot.slane %v1927_v25, %v1769_v17  ;;  %v1327_v34 = vrot.slane %v1319_v40, 7 }
 0x116   : > { %v1336_v44 = vadd.f32 %v1328_v54, %v1293_v21  ;;  %v1209_v43 = vadd.f32 %v1201_v45, %v1166_v36  ;;  %v1287_v35 = vrot.slane %v1279_v1, 6  ;;  %v1294_v38 = vadd.f32 %v1286_v52, %v1251_v22 }
 0x117   : > { %v1321_v12 = vmul.f32 %v2276_v47, %v1846_v63  ;;  %v1322_v8 = vmul.f32 %v2277_v41, %v1866_v39  ;;  %v1335_v11 = vadd.f32 %v1327_v34, %v1292_v27  ;;  %v1350_v30 = vsub.s32 %v1347_v61, %v1746_v9 }
 0x118   : > { %v1252_v42 = vadd.f32 %v1244_v24, %v1209_v43  ;;  %v2278_v25 = vlaneseq }
 0x119   : > { %v1329_v56 = vrot.slane %v1321_v12, 7  ;;  %v1330_v13 = vrot.slane %v1322_v8, 7  ;;  %v1343_v63 = vcombine.low %v1335_v11, %v1336_v44 }
 0x11a   : > { %v1295_v7 = vadd.f32 %v1287_v35, %v1252_v42  ;;  %vm1370_vm2 = vcmp.lt.s32.totalorder %v2278_v25, 512 }
 0x11b   : > { %v1337_v48 = vadd.f32 %v1329_v56, %v1294_v38  ;;  %v1351_v26 = vrot.slane %v1343_v63, %v1350_v30 }
 0x11c   : > { %v1338_v5 = vadd.f32 %v1330_v13, %v1295_v7 }
 0x11e   : > { %v1344_v6 = vcombine.low %v1337_v48, %v1338_v5 }
 0x120   : > { %v1358_v17 = vrot.slane %v1344_v6, %v1350_v30 }
 0x122   : > { %v1359_v39 = vcombine.low %v1351_v26, %v1358_v17 }
 0x124   : > { %v1366_v31 = vrot.slane %v1359_v39, %v1350_v30 }
 0x126   : > { %1372 = vst.msk [vmem:[%s305_s14] sm:$0xf] %vm1370_vm2, %v1366_v31 }
 0x127 PF: > { %s14_s17 = sadd.s32 1, %s1582_s17   ;;  %s2279_s15 = smov %s1578_s16 }
 0x128   : > { %p11_p5 = scmp.ge.s32.totalorder %s14_s17, 4   ;;  %s2280_s16 = smov %s2282_s18 }
 0x12a   :  { %13 = sbr.rel (!%p11_p5) target bundleno = 2 (0x2), region = 75 }

</bundles_post_ra>
